<compile_context>
chip_gen: v7x
topology: tpu7x:2x2x1
jax: 0.10.0
libtpu: 0.0.40
codegen_flags: <defaults>
</compile_context>

<pallas_src>
import jax
import jax.numpy as jnp
from jax import lax
from jax.experimental import pallas as pl
from jax.experimental.pallas import tpu as pltpu

LN_EPS = 1e-5            # torch.nn.LayerNorm default
_FMA_K_MAX = 8           # below this K, use VPU broadcast-FMA instead of a nearly-empty MXU pass
_TARGET_TM = 512         # ~85% of HBM roofline for mem-bound tiles (vs ~29% at tm=128)
_MIN_GRID_STEPS = 2      # keep >= 2 M-steps so v7x's two TensorCores both get work


def _round_up(x, m):
    return ((x + m - 1) // m) * m


# ------------------------------ fused kernel ------------------------------- #

def _make_fc_stack_kernel(layer_meta, out_block_shape):
    """Builds a kernel running the whole FC stack on one resident M-tile.

    layer_meta: tuple of {"ln": bool, "act": str|None, "cout": int} (static).
    out_block_shape: shape the final tile takes before the store (lane-dense
      (rows, 128) slab when possible, else (tm, C_last) -> no-op reshape).
    """

    def kernel(x_ref, *refs):
        o_ref = refs[-1]
        params = refs[:-1]
        in_dtype = x_ref.dtype
        h = x_ref[...]                      # (tm, Cin), native dtype (bf16 stays bf16 on the MXU)
        idx = 0
        n_layers = len(layer_meta)
        for li, meta in enumerate(layer_meta):
            w_ref = params[idx]
            b_ref = params[idx + 1]
            idx += 2
            k = w_ref.shape[0]

            if k <= _FMA_K_MAX:
                # Tiny K: unrolled broadcast-FMA on the VPU (MXU would pad K to 128/256).
                h32 = h.astype(jnp.float32)
                w32 = w_ref[...].astype(jnp.float32)
                y = h32[:, 0:1] * w32[0:1, :]
                for kk in range(1, k):
                    y = y + h32[:, kk:kk + 1] * w32[kk:kk + 1, :]
            else:
                # MXU path: operands in native dtype, f32 accumulation.
                y = jnp.dot(h, w_ref[...], preferred_element_type=jnp.float32)
            y = y + b_ref[...].astype(jnp.float32)

            if meta["ln"]:
                g_ref = params[idx]
                be_ref = params[idx + 1]
                idx += 2
                mean = jnp.mean(y, axis=-1, keepdims=True)
                var = jnp.mean(jnp.square(y - mean), axis=-1, keepdims=True)
                y = (y - mean) * lax.rsqrt(var + LN_EPS)
                y = y * g_ref[...].astype(jnp.float32) + be_ref[...].astype(jnp.float32)

            act = meta["act"]
            if act == "relu":
                y = jnp.maximum(y, 0.0)
            elif act == "sigmoid":
                y = jax.nn.sigmoid(y)
            elif act == "tanh":
                y = jnp.tanh(y)
            elif act is not None:
                raise ValueError(f"unsupported activation: {act!r}")

            if li + 1 < n_layers:
                # Keep bf16 activations bf16 between layers (native MXU path on v6e/v7x);
                # the final layer is cast once at the store instead.
                h = y.astype(in_dtype) if in_dtype == jnp.bfloat16 else y
            else:
                h = y

        o_ref[...] = h.reshape(out_block_shape).astype(o_ref.dtype)

    return kernel


def _vmem_limit_bytes(tm, cin, couts, flat_params):
    """Generous scoped-VMEM request (double-buffered I/O blocks + params + live f32)."""
    lane, f32 = 128, 4
    blk_in = tm * max(cin, lane) * f32
    blk_out = tm * max(couts[-1], lane) * f32
    param_bytes = sum(int(p.shape[0]) * max(int(p.shape[1]), lane) * f32 for p in flat_params)
    live = 3 * tm * max([lane] + list(couts)) * f32
    est = 2 * (blk_in + blk_out + param_bytes) + live + (4 << 20)
    # Stay well below v7x's 64 MiB physical VMEM while exceeding every default scoped limit.
    return int(min(max(est, 32 << 20), 48 << 20))


def _fc_stack_call(x2d, flat_params, layer_meta, tm, *, lane_dense, c_last, out_dtype):
    M_pad, cin = x2d.shape
    grid = (M_pad // tm,)
    couts = [m["cout"] for m in layer_meta]

    x_spec = pl.BlockSpec((tm, cin), lambda i: (i, 0))
    # TODO(synk): for large Cin/Cout (e.g. 2048x2048) the full-weight block (double
    # buffered) would exceed v7x's 64 MiB VMEM; add Cout/K grid axes (256-multiples)
    # with an f32 accumulator scratch + pl.when init/finalize there.
    param_specs = [pl.BlockSpec(p.shape, lambda i: (0, 0)) for p in flat_params]

    if lane_dense:
        rows_blk = (tm * c_last) // 128
        out_shape = jax.ShapeDtypeStruct((M_pad * c_last // 128, 128), out_dtype)
        out_spec = pl.BlockSpec((rows_blk, 128), lambda i: (i, 0))
        out_block_shape = (rows_blk, 128)
    else:
        out_shape = jax.ShapeDtypeStruct((M_pad, c_last), out_dtype)
        out_spec = pl.BlockSpec((tm, c_last), lambda i: (i, 0))
        out_block_shape = (tm, c_last)

    kernel = _make_fc_stack_kernel(tuple(layer_meta), out_block_shape)

    y = pl.pallas_call(
        kernel,
        grid=grid,
        in_specs=[x_spec] + param_specs,
        out_specs=out_spec,
        out_shape=out_shape,
        compiler_params=pltpu.CompilerParams(
            dimension_semantics=("parallel",),
            vmem_limit_bytes=_vmem_limit_bytes(tm, cin, couts, flat_params),
        ),
    )(x2d, *flat_params)

    if lane_dense:
        y = y.reshape(M_pad, c_last)   # free: bytes are already row-major contiguous
    return y


# --------------------------------- FC model -------------------------------- #

def init_fc_params(key, input_dim, output_dims):
    """Deterministic init mirroring nn.Conv2d (uniform +/- 1/sqrt(fan_in)) + LayerNorm."""
    params = []
    in_dim = input_dim
    for out_dim in output_dims:
        key, k1, k2 = jax.random.split(key, 3)
        bound = 1.0 / jnp.sqrt(in_dim)  # 1x1 conv fan_in = in_dim
        w = jax.random.uniform(k1, (in_dim, out_dim), jnp.float32, -bound, bound)
        b = jax.random.uniform(k2, (out_dim,), jnp.float32, -bound, bound)
        params.append({"w": w, "b": b,
                       "gamma": jnp.ones((out_dim,), jnp.float32),
                       "beta": jnp.zeros((out_dim,), jnp.float32)})
        in_dim = out_dim
    return params


def fc_forward(x_nhwc, params, activations, bn=True, lane_dense=True):
    """Fused forward of the FC stack. x_nhwc: (N, H, W, Cin) -> (N, H, W, output_dims[-1]).

    Note: in the reference PyTorch module `self.bn` holds an nn.LayerNorm whenever
    activation is not None, and `if self.bn:` is always truthy, so LayerNorm is
    applied for every activated layer; bn=True reproduces that.  bn=False skips LN
    but still applies the activation (fused in-kernel, all of relu/sigmoid/tanh).
    """
    # TODO(synk): nn.Dropout (drop != None) is identity in eval mode; training-mode
    # dropout is not implemented here.
    assert len(params) == len(activations)
    N, H, W, cin = x_nhwc.shape
    M = N * H * W
    c_last = params[-1]["w"].shape[1]
    out_dtype = x_nhwc.dtype

    layer_meta, flat_params = [], []
    for p, act in zip(params, activations):
        has_ln = (act is not None) and bool(bn)
        cout = p["w"].shape[1]
        layer_meta.append({"ln": has_ln, "act": act, "cout": cout})
        flat_params.append(p["w"])
        flat_params.append(p["b"].reshape(1, cout))
        if has_ln:
            flat_params.append(p["gamma"].reshape(1, cout))
            flat_params.append(p["beta"].reshape(1, cout))

    # Row tile: big enough to approach the HBM roofline, small enough to keep
    # >= 2 grid steps (v7x megacore), then pad M to a tile multiple.
    tm = _TARGET_TM
    while tm > 128 and pl.cdiv(M, tm) < _MIN_GRID_STEPS:
        tm //= 2
    tm = max(8, min(tm, _round_up(M, 8)))
    M_pad = _round_up(M, tm)

    x2d = x_nhwc.reshape(M, cin)
    if M_pad != M:
        x2d = jnp.pad(x2d, ((0, M_pad - M), (0, 0)))

    can_dense = (
        lane_dense
        and c_last < 128
        and (tm * c_last) % 128 == 0
        and ((tm * c_last) // 128) % 8 == 0
    )
    y2d = None
    if can_dense:
        try:
            y2d = _fc_stack_call(x2d, flat_params, layer_meta, tm,
                                 lane_dense=True, c_last=c_last, out_dtype=out_dtype)
        except Exception:
            # The in-kernel (tm, C_last) -> (rows, 128) relayout may not lower on
            # every Mosaic version; fall back to the plain narrow output block.
            y2d = None
    if y2d is None:
        y2d = _fc_stack_call(x2d, flat_params, layer_meta, tm,
                             lane_dense=False, c_last=c_last, out_dtype=out_dtype)

    if M_pad != M:
        y2d = y2d[:M]          # only slice when padding was actually added
    return y2d.reshape(N, H, W, c_last)


# ------------------------------ pure-JAX reference -------------------------- #

def fc_reference(x_nhwc, params, activations, bn=True):
    N, H, W, _ = x_nhwc.shape
    h = x_nhwc.astype(jnp.float32).reshape(N * H * W, -1)
    for p, act in zip(params, activations):
        h = h @ p["w"] + p["b"]
        if act is not None:
            if bn:
                mean = jnp.mean(h, axis=-1, keepdims=True)
                var = jnp.mean((h - mean) ** 2, axis=-1, keepdims=True)
                h = (h - mean) / jnp.sqrt(var + LN_EPS)
                h = h * p["gamma"] + p["beta"]
            if act == "relu":
                h = jnp.maximum(h, 0.0)
            elif act == "sigmoid":
                h = jax.nn.sigmoid(h)
            elif act == "tanh":
                h = jnp.tanh(h)
    return h.reshape(N, H, W, -1).astype(x_nhwc.dtype)


# ----------------------------------- main ----------------------------------- #

if __name__ == "__main__":
    key = jax.random.PRNGKey(0)
    k_in, k_param = jax.random.split(key)

    # FC(input_dim=4, output_dims=[32, 8], activations=['relu', None], bn=True)
    N, H, W, C_IN = 2, 16, 16, 4
    OUTPUT_DIMS = [32, 8]
    ACTIVATIONS = ["relu", None]

    x = jax.random.normal(k_in, (N, H, W, C_IN), jnp.float32)
    params = init_fc_params(k_param, C_IN, OUTPUT_DIMS)

    out = fc_forward(x, params, ACTIVATIONS, bn=True)
    out = jax.block_until_ready(out)

    assert out.shape == (N, H, W, OUTPUT_DIMS[-1]), out.shape
    assert bool(jnp.all(jnp.isfinite(out)))

    ref = fc_reference(x, params, ACTIVATIONS, bn=True)
    err = float(jnp.max(jnp.abs(out.astype(jnp.float32) - ref.astype(jnp.float32))))
    assert err < 1e-3, f"max abs error vs reference: {err}"

    print("KERNEL_OK")
</pallas_src>

<mosaic_0001>
module attributes {stable_mosaic.version = 11 : i64} {
  func.func @kernel(%arg0: i32, %arg1: memref<256x4xf32, #tpu.memory_space<vmem>>, %arg2: memref<4x32xf32, #tpu.memory_space<vmem>>, %arg3: memref<1x32xf32, #tpu.memory_space<vmem>>, %arg4: memref<1x32xf32, #tpu.memory_space<vmem>>, %arg5: memref<1x32xf32, #tpu.memory_space<vmem>>, %arg6: memref<32x8xf32, #tpu.memory_space<vmem>>, %arg7: memref<1x8xf32, #tpu.memory_space<vmem>>, %arg8: memref<16x128xf32, #tpu.memory_space<vmem>>) attributes {dimension_semantics = [#tpu.dimension_semantics<parallel>], iteration_bounds = array<i64: 2>, scalar_prefetch = 0 : i64, scratch_operands = 0 : i64, tpu.core_type = #tpu.core_type<tc>, window_params = [{transform_indices = @transform_0, window_bounds = array<i64: 256, 4>}, {pipeline_mode = #tpu.pipeline_mode<synchronous>, transform_indices = @transform_1, window_bounds = array<i64: 4, 32>}, {pipeline_mode = #tpu.pipeline_mode<synchronous>, transform_indices = @transform_2, window_bounds = array<i64: 1, 32>}, {pipeline_mode = #tpu.pipeline_mode<synchronous>, transform_indices = @transform_3, window_bounds = array<i64: 1, 32>}, {pipeline_mode = #tpu.pipeline_mode<synchronous>, transform_indices = @transform_4, window_bounds = array<i64: 1, 32>}, {pipeline_mode = #tpu.pipeline_mode<synchronous>, transform_indices = @transform_5, window_bounds = array<i64: 32, 8>}, {pipeline_mode = #tpu.pipeline_mode<synchronous>, transform_indices = @transform_6, window_bounds = array<i64: 1, 8>}, {transform_indices = @transform_7, window_bounds = array<i64: 16, 128>}]} {
    %c0 = arith.constant 0 : index
    %c0_0 = arith.constant 0 : index
    %0 = vector.load %arg1[%c0, %c0_0] : memref<256x4xf32, #tpu.memory_space<vmem>>, vector<256x4xf32>
    %c0_1 = arith.constant 0 : index
    %c0_2 = arith.constant 0 : index
    %1 = vector.load %arg2[%c0_1, %c0_2] : memref<4x32xf32, #tpu.memory_space<vmem>>, vector<4x32xf32>
    %2 = vector.extract_strided_slice %0 {offsets = [0, 0], sizes = [256, 1], strides = [1, 1]} : vector<256x4xf32> to vector<256x1xf32>
    %3 = vector.extract_strided_slice %1 {offsets = [0, 0], sizes = [1, 32], strides = [1, 1]} : vector<4x32xf32> to vector<1x32xf32>
    %4 = vector.broadcast %2 : vector<256x1xf32> to vector<256x32xf32>
    %5 = vector.broadcast %3 : vector<1x32xf32> to vector<256x32xf32>
    %6 = arith.mulf %4, %5 : vector<256x32xf32>
    %7 = vector.extract_strided_slice %0 {offsets = [0, 1], sizes = [256, 1], strides = [1, 1]} : vector<256x4xf32> to vector<256x1xf32>
    %8 = vector.extract_strided_slice %1 {offsets = [1, 0], sizes = [1, 32], strides = [1, 1]} : vector<4x32xf32> to vector<1x32xf32>
    %9 = vector.broadcast %7 : vector<256x1xf32> to vector<256x32xf32>
    %10 = vector.broadcast %8 : vector<1x32xf32> to vector<256x32xf32>
    %11 = arith.mulf %9, %10 : vector<256x32xf32>
    %12 = arith.addf %6, %11 : vector<256x32xf32>
    %13 = vector.extract_strided_slice %0 {offsets = [0, 2], sizes = [256, 1], strides = [1, 1]} : vector<256x4xf32> to vector<256x1xf32>
    %14 = vector.extract_strided_slice %1 {offsets = [2, 0], sizes = [1, 32], strides = [1, 1]} : vector<4x32xf32> to vector<1x32xf32>
    %15 = vector.broadcast %13 : vector<256x1xf32> to vector<256x32xf32>
    %16 = vector.broadcast %14 : vector<1x32xf32> to vector<256x32xf32>
    %17 = arith.mulf %15, %16 : vector<256x32xf32>
    %18 = arith.addf %12, %17 : vector<256x32xf32>
    %19 = vector.extract_strided_slice %0 {offsets = [0, 3], sizes = [256, 1], strides = [1, 1]} : vector<256x4xf32> to vector<256x1xf32>
    %20 = vector.extract_strided_slice %1 {offsets = [3, 0], sizes = [1, 32], strides = [1, 1]} : vector<4x32xf32> to vector<1x32xf32>
    %21 = vector.broadcast %19 : vector<256x1xf32> to vector<256x32xf32>
    %22 = vector.broadcast %20 : vector<1x32xf32> to vector<256x32xf32>
    %23 = arith.mulf %21, %22 : vector<256x32xf32>
    %24 = arith.addf %18, %23 : vector<256x32xf32>
    %c0_3 = arith.constant 0 : index
    %c0_4 = arith.constant 0 : index
    %25 = vector.load %arg3[%c0_3, %c0_4] : memref<1x32xf32, #tpu.memory_space<vmem>>, vector<1x32xf32>
    %26 = vector.broadcast %25 : vector<1x32xf32> to vector<256x32xf32>
    %27 = arith.addf %24, %26 : vector<256x32xf32>
    %cst = arith.constant dense<0.000000e+00> : vector<256xf32>
    %28 = vector.multi_reduction <add>, %27, %cst [1] : vector<256x32xf32> to vector<256xf32>
    %29 = vector.shape_cast %28 : vector<256xf32> to vector<256x1xf32>
    %cst_5 = arith.constant 3.200000e+01 : f32
    %30 = vector.broadcast %cst_5 : f32 to vector<256x1xf32>
    %31 = arith.divf %29, %30 : vector<256x1xf32>
    %32 = vector.broadcast %31 : vector<256x1xf32> to vector<256x32xf32>
    %33 = arith.subf %27, %32 : vector<256x32xf32>
    %34 = arith.mulf %33, %33 : vector<256x32xf32>
    %cst_6 = arith.constant dense<0.000000e+00> : vector<256xf32>
    %35 = vector.multi_reduction <add>, %34, %cst_6 [1] : vector<256x32xf32> to vector<256xf32>
    %36 = vector.shape_cast %35 : vector<256xf32> to vector<256x1xf32>
    %cst_7 = arith.constant 3.200000e+01 : f32
    %37 = vector.broadcast %cst_7 : f32 to vector<256x1xf32>
    %38 = arith.divf %36, %37 : vector<256x1xf32>
    %39 = vector.broadcast %31 : vector<256x1xf32> to vector<256x32xf32>
    %40 = arith.subf %27, %39 : vector<256x32xf32>
    %cst_8 = arith.constant 9.99999974E-6 : f32
    %41 = vector.broadcast %cst_8 : f32 to vector<256x1xf32>
    %42 = arith.addf %38, %41 : vector<256x1xf32>
    %43 = math.rsqrt %42 : vector<256x1xf32>
    %44 = vector.broadcast %43 : vector<256x1xf32> to vector<256x32xf32>
    %45 = arith.mulf %40, %44 : vector<256x32xf32>
    %c0_9 = arith.constant 0 : index
    %c0_10 = arith.constant 0 : index
    %46 = vector.load %arg4[%c0_9, %c0_10] : memref<1x32xf32, #tpu.memory_space<vmem>>, vector<1x32xf32>
    %47 = vector.broadcast %46 : vector<1x32xf32> to vector<256x32xf32>
    %48 = arith.mulf %45, %47 : vector<256x32xf32>
    %c0_11 = arith.constant 0 : index
    %c0_12 = arith.constant 0 : index
    %49 = vector.load %arg5[%c0_11, %c0_12] : memref<1x32xf32, #tpu.memory_space<vmem>>, vector<1x32xf32>
    %50 = vector.broadcast %49 : vector<1x32xf32> to vector<256x32xf32>
    %51 = arith.addf %48, %50 : vector<256x32xf32>
    %cst_13 = arith.constant 0.000000e+00 : f32
    %52 = vector.broadcast %cst_13 : f32 to vector<256x32xf32>
    %53 = arith.maximumf %51, %52 : vector<256x32xf32>
    %c0_14 = arith.constant 0 : index
    %c0_15 = arith.constant 0 : index
    %54 = vector.load %arg6[%c0_14, %c0_15] : memref<32x8xf32, #tpu.memory_space<vmem>>, vector<32x8xf32>
    %cst_16 = arith.constant dense<0.000000e+00> : vector<256x8xf32>
    %55 = tpu.matmul %53, %54, %cst_16 {dimension_numbers = #tpu.dot_dimension_numbers<[1], [0], [0], [1], [0, 0, 1, 1], [], []>} : vector<256x32xf32>, vector<32x8xf32>, vector<256x8xf32> -> vector<256x8xf32>
    %c0_17 = arith.constant 0 : index
    %c0_18 = arith.constant 0 : index
    %56 = vector.load %arg7[%c0_17, %c0_18] : memref<1x8xf32, #tpu.memory_space<vmem>>, vector<1x8xf32>
    %57 = vector.broadcast %56 : vector<1x8xf32> to vector<256x8xf32>
    %58 = arith.addf %55, %57 : vector<256x8xf32>
    %59 = vector.shape_cast %58 : vector<256x8xf32> to vector<16x128xf32>
    %c0_19 = arith.constant 0 : index
    %c0_20 = arith.constant 0 : index
    %60 = vector.load %arg8[%c0_19, %c0_20] : memref<16x128xf32, #tpu.memory_space<vmem>>, vector<16x128xf32>
    tpu.vector_store %arg8[%c0_19, %c0_20], %59 {strides = array<i32>} : memref<16x128xf32, #tpu.memory_space<vmem>>, vector<16x128xf32>,
    return
  }
  func.func @transform_0(%arg0: i32) -> (i32, i32) {
    %c0_i32 = arith.constant 0 : i32
    %c0_i32_0 = arith.constant 0 : i32
    return %arg0, %c0_i32 : i32, i32
  }
  func.func @transform_1(%arg0: i32) -> (i32, i32) {
    %c0_i32 = arith.constant 0 : i32
    %c0_i32_0 = arith.constant 0 : i32
    %c0_i32_1 = arith.constant 0 : i32
    return %c0_i32, %c0_i32_0 : i32, i32
  }
  func.func @transform_2(%arg0: i32) -> (i32, i32) {
    %c0_i32 = arith.constant 0 : i32
    %c0_i32_0 = arith.constant 0 : i32
    %c0_i32_1 = arith.constant 0 : i32
    return %c0_i32, %c0_i32_0 : i32, i32
  }
  func.func @transform_3(%arg0: i32) -> (i32, i32) {
    %c0_i32 = arith.constant 0 : i32
    %c0_i32_0 = arith.constant 0 : i32
    %c0_i32_1 = arith.constant 0 : i32
    return %c0_i32, %c0_i32_0 : i32, i32
  }
  func.func @transform_4(%arg0: i32) -> (i32, i32) {
    %c0_i32 = arith.constant 0 : i32
    %c0_i32_0 = arith.constant 0 : i32
    %c0_i32_1 = arith.constant 0 : i32
    return %c0_i32, %c0_i32_0 : i32, i32
  }
  func.func @transform_5(%arg0: i32) -> (i32, i32) {
    %c0_i32 = arith.constant 0 : i32
    %c0_i32_0 = arith.constant 0 : i32
    %c0_i32_1 = arith.constant 0 : i32
    return %c0_i32, %c0_i32_0 : i32, i32
  }
  func.func @transform_6(%arg0: i32) -> (i32, i32) {
    %c0_i32 = arith.constant 0 : i32
    %c0_i32_0 = arith.constant 0 : i32
    %c0_i32_1 = arith.constant 0 : i32
    return %c0_i32, %c0_i32_0 : i32, i32
  }
  func.func @transform_7(%arg0: i32) -> (i32, i32) {
    %c0_i32 = arith.constant 0 : i32
    %c0_i32_0 = arith.constant 0 : i32
    return %arg0, %c0_i32 : i32, i32
  }
}

module attributes {stable_mosaic.version = 11 : i64} {
  func.func @kernel(%arg0: i32, %arg1: memref<256x4xf32, #tpu.memory_space<vmem>>, %arg2: memref<4x32xf32, #tpu.memory_space<vmem>>, %arg3: memref<1x32xf32, #tpu.memory_space<vmem>>, %arg4: memref<1x32xf32, #tpu.memory_space<vmem>>, %arg5: memref<1x32xf32, #tpu.memory_space<vmem>>, %arg6: memref<32x8xf32, #tpu.memory_space<vmem>>, %arg7: memref<1x8xf32, #tpu.memory_space<vmem>>, %arg8: memref<256x8xf32, #tpu.memory_space<vmem>>) attributes {dimension_semantics = [#tpu.dimension_semantics<parallel>], iteration_bounds = array<i64: 2>, scalar_prefetch = 0 : i64, scratch_operands = 0 : i64, tpu.core_type = #tpu.core_type<tc>, window_params = [{transform_indices = @transform_0, window_bounds = array<i64: 256, 4>}, {pipeline_mode = #tpu.pipeline_mode<synchronous>, transform_indices = @transform_1, window_bounds = array<i64: 4, 32>}, {pipeline_mode = #tpu.pipeline_mode<synchronous>, transform_indices = @transform_2, window_bounds = array<i64: 1, 32>}, {pipeline_mode = #tpu.pipeline_mode<synchronous>, transform_indices = @transform_3, window_bounds = array<i64: 1, 32>}, {pipeline_mode = #tpu.pipeline_mode<synchronous>, transform_indices = @transform_4, window_bounds = array<i64: 1, 32>}, {pipeline_mode = #tpu.pipeline_mode<synchronous>, transform_indices = @transform_5, window_bounds = array<i64: 32, 8>}, {pipeline_mode = #tpu.pipeline_mode<synchronous>, transform_indices = @transform_6, window_bounds = array<i64: 1, 8>}, {transform_indices = @transform_7, window_bounds = array<i64: 256, 8>}]} {
    %c0 = arith.constant 0 : index
    %c0_0 = arith.constant 0 : index
    %0 = vector.load %arg1[%c0, %c0_0] : memref<256x4xf32, #tpu.memory_space<vmem>>, vector<256x4xf32>
    %c0_1 = arith.constant 0 : index
    %c0_2 = arith.constant 0 : index
    %1 = vector.load %arg2[%c0_1, %c0_2] : memref<4x32xf32, #tpu.memory_space<vmem>>, vector<4x32xf32>
    %2 = vector.extract_strided_slice %0 {offsets = [0, 0], sizes = [256, 1], strides = [1, 1]} : vector<256x4xf32> to vector<256x1xf32>
    %3 = vector.extract_strided_slice %1 {offsets = [0, 0], sizes = [1, 32], strides = [1, 1]} : vector<4x32xf32> to vector<1x32xf32>
    %4 = vector.broadcast %2 : vector<256x1xf32> to vector<256x32xf32>
    %5 = vector.broadcast %3 : vector<1x32xf32> to vector<256x32xf32>
    %6 = arith.mulf %4, %5 : vector<256x32xf32>
    %7 = vector.extract_strided_slice %0 {offsets = [0, 1], sizes = [256, 1], strides = [1, 1]} : vector<256x4xf32> to vector<256x1xf32>
    %8 = vector.extract_strided_slice %1 {offsets = [1, 0], sizes = [1, 32], strides = [1, 1]} : vector<4x32xf32> to vector<1x32xf32>
    %9 = vector.broadcast %7 : vector<256x1xf32> to vector<256x32xf32>
    %10 = vector.broadcast %8 : vector<1x32xf32> to vector<256x32xf32>
    %11 = arith.mulf %9, %10 : vector<256x32xf32>
    %12 = arith.addf %6, %11 : vector<256x32xf32>
    %13 = vector.extract_strided_slice %0 {offsets = [0, 2], sizes = [256, 1], strides = [1, 1]} : vector<256x4xf32> to vector<256x1xf32>
    %14 = vector.extract_strided_slice %1 {offsets = [2, 0], sizes = [1, 32], strides = [1, 1]} : vector<4x32xf32> to vector<1x32xf32>
    %15 = vector.broadcast %13 : vector<256x1xf32> to vector<256x32xf32>
    %16 = vector.broadcast %14 : vector<1x32xf32> to vector<256x32xf32>
    %17 = arith.mulf %15, %16 : vector<256x32xf32>
    %18 = arith.addf %12, %17 : vector<256x32xf32>
    %19 = vector.extract_strided_slice %0 {offsets = [0, 3], sizes = [256, 1], strides = [1, 1]} : vector<256x4xf32> to vector<256x1xf32>
    %20 = vector.extract_strided_slice %1 {offsets = [3, 0], sizes = [1, 32], strides = [1, 1]} : vector<4x32xf32> to vector<1x32xf32>
    %21 = vector.broadcast %19 : vector<256x1xf32> to vector<256x32xf32>
    %22 = vector.broadcast %20 : vector<1x32xf32> to vector<256x32xf32>
    %23 = arith.mulf %21, %22 : vector<256x32xf32>
    %24 = arith.addf %18, %23 : vector<256x32xf32>
    %c0_3 = arith.constant 0 : index
    %c0_4 = arith.constant 0 : index
    %25 = vector.load %arg3[%c0_3, %c0_4] : memref<1x32xf32, #tpu.memory_space<vmem>>, vector<1x32xf32>
    %26 = vector.broadcast %25 : vector<1x32xf32> to vector<256x32xf32>
    %27 = arith.addf %24, %26 : vector<256x32xf32>
    %cst = arith.constant dense<0.000000e+00> : vector<256xf32>
    %28 = vector.multi_reduction <add>, %27, %cst [1] : vector<256x32xf32> to vector<256xf32>
    %29 = vector.shape_cast %28 : vector<256xf32> to vector<256x1xf32>
    %cst_5 = arith.constant 3.200000e+01 : f32
    %30 = vector.broadcast %cst_5 : f32 to vector<256x1xf32>
    %31 = arith.divf %29, %30 : vector<256x1xf32>
    %32 = vector.broadcast %31 : vector<256x1xf32> to vector<256x32xf32>
    %33 = arith.subf %27, %32 : vector<256x32xf32>
    %34 = arith.mulf %33, %33 : vector<256x32xf32>
    %cst_6 = arith.constant dense<0.000000e+00> : vector<256xf32>
    %35 = vector.multi_reduction <add>, %34, %cst_6 [1] : vector<256x32xf32> to vector<256xf32>
    %36 = vector.shape_cast %35 : vector<256xf32> to vector<256x1xf32>
    %cst_7 = arith.constant 3.200000e+01 : f32
    %37 = vector.broadcast %cst_7 : f32 to vector<256x1xf32>
    %38 = arith.divf %36, %37 : vector<256x1xf32>
    %39 = vector.broadcast %31 : vector<256x1xf32> to vector<256x32xf32>
    %40 = arith.subf %27, %39 : vector<256x32xf32>
    %cst_8 = arith.constant 9.99999974E-6 : f32
    %41 = vector.broadcast %cst_8 : f32 to vector<256x1xf32>
    %42 = arith.addf %38, %41 : vector<256x1xf32>
    %43 = math.rsqrt %42 : vector<256x1xf32>
    %44 = vector.broadcast %43 : vector<256x1xf32> to vector<256x32xf32>
    %45 = arith.mulf %40, %44 : vector<256x32xf32>
    %c0_9 = arith.constant 0 : index
    %c0_10 = arith.constant 0 : index
    %46 = vector.load %arg4[%c0_9, %c0_10] : memref<1x32xf32, #tpu.memory_space<vmem>>, vector<1x32xf32>
    %47 = vector.broadcast %46 : vector<1x32xf32> to vector<256x32xf32>
    %48 = arith.mulf %45, %47 : vector<256x32xf32>
    %c0_11 = arith.constant 0 : index
    %c0_12 = arith.constant 0 : index
    %49 = vector.load %arg5[%c0_11, %c0_12] : memref<1x32xf32, #tpu.memory_space<vmem>>, vector<1x32xf32>
    %50 = vector.broadcast %49 : vector<1x32xf32> to vector<256x32xf32>
    %51 = arith.addf %48, %50 : vector<256x32xf32>
    %cst_13 = arith.constant 0.000000e+00 : f32
    %52 = vector.broadcast %cst_13 : f32 to vector<256x32xf32>
    %53 = arith.maximumf %51, %52 : vector<256x32xf32>
    %c0_14 = arith.constant 0 : index
    %c0_15 = arith.constant 0 : index
    %54 = vector.load %arg6[%c0_14, %c0_15] : memref<32x8xf32, #tpu.memory_space<vmem>>, vector<32x8xf32>
    %cst_16 = arith.constant dense<0.000000e+00> : vector<256x8xf32>
    %55 = tpu.matmul %53, %54, %cst_16 {dimension_numbers = #tpu.dot_dimension_numbers<[1], [0], [0], [1], [0, 0, 1, 1], [], []>} : vector<256x32xf32>, vector<32x8xf32>, vector<256x8xf32> -> vector<256x8xf32>
    %c0_17 = arith.constant 0 : index
    %c0_18 = arith.constant 0 : index
    %56 = vector.load %arg7[%c0_17, %c0_18] : memref<1x8xf32, #tpu.memory_space<vmem>>, vector<1x8xf32>
    %57 = vector.broadcast %56 : vector<1x8xf32> to vector<256x8xf32>
    %58 = arith.addf %55, %57 : vector<256x8xf32>
    %c0_19 = arith.constant 0 : index
    %c0_20 = arith.constant 0 : index
    %59 = vector.load %arg8[%c0_19, %c0_20] : memref<256x8xf32, #tpu.memory_space<vmem>>, vector<256x8xf32>
    tpu.vector_store %arg8[%c0_19, %c0_20], %58 {strides = array<i32>} : memref<256x8xf32, #tpu.memory_space<vmem>>, vector<256x8xf32>,
    return
  }
  func.func @transform_0(%arg0: i32) -> (i32, i32) {
    %c0_i32 = arith.constant 0 : i32
    %c0_i32_0 = arith.constant 0 : i32
    return %arg0, %c0_i32 : i32, i32
  }
  func.func @transform_1(%arg0: i32) -> (i32, i32) {
    %c0_i32 = arith.constant 0 : i32
    %c0_i32_0 = arith.constant 0 : i32
    %c0_i32_1 = arith.constant 0 : i32
    return %c0_i32, %c0_i32_0 : i32, i32
  }
  func.func @transform_2(%arg0: i32) -> (i32, i32) {
    %c0_i32 = arith.constant 0 : i32
    %c0_i32_0 = arith.constant 0 : i32
    %c0_i32_1 = arith.constant 0 : i32
    return %c0_i32, %c0_i32_0 : i32, i32
  }
  func.func @transform_3(%arg0: i32) -> (i32, i32) {
    %c0_i32 = arith.constant 0 : i32
    %c0_i32_0 = arith.constant 0 : i32
    %c0_i32_1 = arith.constant 0 : i32
    return %c0_i32, %c0_i32_0 : i32, i32
  }
  func.func @transform_4(%arg0: i32) -> (i32, i32) {
    %c0_i32 = arith.constant 0 : i32
    %c0_i32_0 = arith.constant 0 : i32
    %c0_i32_1 = arith.constant 0 : i32
    return %c0_i32, %c0_i32_0 : i32, i32
  }
  func.func @transform_5(%arg0: i32) -> (i32, i32) {
    %c0_i32 = arith.constant 0 : i32
    %c0_i32_0 = arith.constant 0 : i32
    %c0_i32_1 = arith.constant 0 : i32
    return %c0_i32, %c0_i32_0 : i32, i32
  }
  func.func @transform_6(%arg0: i32) -> (i32, i32) {
    %c0_i32 = arith.constant 0 : i32
    %c0_i32_0 = arith.constant 0 : i32
    %c0_i32_1 = arith.constant 0 : i32
    return %c0_i32, %c0_i32_0 : i32, i32
  }
  func.func @transform_7(%arg0: i32) -> (i32, i32) {
    %c0_i32 = arith.constant 0 : i32
    %c0_i32_0 = arith.constant 0 : i32
    return %arg0, %c0_i32 : i32, i32
  }
}

</mosaic_0001>

<bundles_post_ra>
// kernel: tpu_custom_call.1
= control target key start
LH: loop header
LB: loop body
LE: loop exit
PB: predicated region body
PF: predicated region fallthrough
CT: control target
= control target key end

     0   :  { %s2406_s24 = smov 0   ;;  %s3680_s0 = inlined_call_operand.vmem [shape: f32[512,4], index: 0, kind: input, shape index: {}]   ;;  %s3681_s1 = inlined_call_operand.vmem [shape: f32[4,32], index: 1, kind: input, shape index: {}]   ;;  %s3682_s2 = inlined_call_operand.vmem [shape: f32[1,32], index: 2, kind: input, shape index: {}]   ;;  %s3683_s3 = inlined_call_operand.vmem [shape: f32[1,32], index: 3, kind: input, shape index: {}]   ;;  %s3684_s4 = inlined_call_operand.vmem [shape: f32[1,32], index: 4, kind: input, shape index: {}]   ;;  %s3685_s5 = inlined_call_operand.vmem [shape: f32[32,8], index: 5, kind: input, shape index: {}]   ;;  %s3686_s6 = inlined_call_operand.vmem [shape: f32[1,8], index: 6, kind: input, shape index: {}]   ;;  %s3687_s7 = inlined_call_operand.vmem [shape: f32[512,8], index: 7, kind: output, shape index: {}]  }
   0x1 LB: > { %s2087_s25 = sadd.s32 4294967295, %s2360_s24   ;;  %p2091_p0 = scmp.ge.s32.totalorder %s2360_s24, 1  ;;  %s2360_s24 = sphi %s2406_s24, %s17_s24  }
   0x2   : > { %p238_p1 = scmp.lt.s32.totalorder %s2360_s24, 3 }
   0x4   : > { %p239_p2 = pnand %p2091_p0, %p238_p1 }
   0x6   : > { %242 = sbr.rel (%p239_p2) target bundleno = 1016 (0x3f8), region = 48 }
   0xd   : > { %s2092_s26 = sshll.u32 %s2087_s25, 5  ;;  %v2362_v0 = vmov 0   ;;  %v3692_v33 = vmov 1   ;;  %v3688_v34 = vmov 2   ;;  %v3690_v35 = vmov 3  }
   0xe   : > { %2251 = vset.pattern.permute.xlu1 %v2362_v0  ;;  %2250 = vset.pattern.permute.xlu0 %v2362_v0  ;;  %p271_p3 = scmp.lt.s32.totalorder %s2092_s26, 63  ;;  %vm1138_vm0 = vcmask 261120   ;;  %vm1998_vm1 = vcmask 64512  }
  0x10   : > { %s3762_s26 = smov (!%p271_p3, %s2092_s26), 63 }
  0x11   : > { %s2093_s27 = sshll.u32 %s3762_s26, 3 }
  0x12   : > { %s2422_s30 = scalar_lea.vmem %s3680_s0, %s2093_s27  ;;  %s3579_s8 = scalar_lea.vmem %s3687_s7, %s2093_s27 }
  0x13   : > { %v2425_v1 = vld [vmem:[%s2422_s30 + $0x10] sm:$0xff]  ;;  %v2428_v2 = vld [vmem:[%s2422_s30] sm:$0xff]  ;;  %v2433_v3 = vld [vmem:[%s2422_s30 + $0x18] sm:$0xff] }
  0x14   : > { %327 = vperm.xlu1 %2251, %v2425_v1   ;;  %317 = vperm.xlu0 %2250, %v2428_v2   ;;  %v2436_v4 = vld [vmem:[%s2422_s30 + $0x8] sm:$0xff]  ;;  %v2444_v6 = vld [vmem:[%s2422_s30 + $0x20] sm:$0xff]  ;;  %v2449_v7 = vld [vmem:[%s2422_s30 + $0x38] sm:$0xff] }
  0x15   : > { %v2441_v5 = vld [vmem:[%s2422_s30 + $0x28] sm:$0xff]  ;;  %v2452_v8 = vld [vmem:[%s2422_s30 + $0x30] sm:$0xff]  ;;  %v2460_v10 = vld [vmem:[%s2422_s30 + $0x40] sm:$0xff] }
  0x16   : > { %v2457_v9 = vld [vmem:[%s2422_s30 + $0x48] sm:$0xff]  ;;  %v2465_v11 = vld [vmem:[%s2422_s30 + $0x58] sm:$0xff]  ;;  %v2468_v12 = vld [vmem:[%s2422_s30 + $0x50] sm:$0xff] }
  0x17   : > { %v2473_v13 = vld [vmem:[%s2422_s30 + $0x68] sm:$0xff]  ;;  %v2476_v14 = vld [vmem:[%s2422_s30 + $0x60] sm:$0xff]  ;;  %v2481_v15 = vld [vmem:[%s2422_s30 + $0x78] sm:$0xff] }
  0x18   : > { %332 = vperm.xlu1 %2251, %v2433_v3   ;;  %322 = vperm.xlu0 %2250, %v2436_v4   ;;  %v2484_v16 = vld [vmem:[%s2422_s30 + $0x70] sm:$0xff]  ;;  %v2489_v17 = vld [vmem:[%s2422_s30 + $0x88] sm:$0xff]  ;;  %v2492_v18 = vld [vmem:[%s2422_s30 + $0x80] sm:$0xff] }
  0x19   : > { %v2497_v19 = vld [vmem:[%s2422_s30 + $0x98] sm:$0xff]  ;;  %v2500_v20 = vld [vmem:[%s2422_s30 + $0x90] sm:$0xff]  ;;  %v2505_v21 = vld [vmem:[%s2422_s30 + $0xa8] sm:$0xff] }
  0x1a   : > { %v2508_v22 = vld [vmem:[%s2422_s30 + $0xa0] sm:$0xff]  ;;  %v2513_v23 = vld [vmem:[%s2422_s30 + $0xb8] sm:$0xff]  ;;  %v2516_v24 = vld [vmem:[%s2422_s30 + $0xb0] sm:$0xff] }
  0x1b   : > { %v2521_v25 = vld [vmem:[%s2422_s30 + $0xc8] sm:$0xff]  ;;  %v2524_v26 = vld [vmem:[%s2422_s30 + $0xc0] sm:$0xff]  ;;  %v2529_v27 = vld [vmem:[%s2422_s30 + $0xd8] sm:$0xff] }
  0x1c   : > { %342 = vperm.xlu1 %2251, %v2441_v5   ;;  %337 = vperm.xlu0 %2250, %v2444_v6   ;;  %v2532_v28 = vld [vmem:[%s2422_s30 + $0xd0] sm:$0xff]  ;;  %v2537_v29 = vld [vmem:[%s2422_s30 + $0xe8] sm:$0xff]  ;;  %v2540_v30 = vld [vmem:[%s2422_s30 + $0xe0] sm:$0xff] }
  0x1d   : > { %v2545_v31 = vld [vmem:[%s2422_s30 + $0xf8] sm:$0xff]  ;;  %v2548_v32 = vld [vmem:[%s2422_s30 + $0xf0] sm:$0xff] }
  0x20   : > { %352 = vperm.xlu1 %2251, %v2449_v7   ;;  %347 = vperm.xlu0 %2250, %v2452_v8  }
  0x24   : > { %362 = vperm.xlu1 %2251, %v2457_v9   ;;  %357 = vperm.xlu0 %2250, %v2460_v10  }
  0x28   : > { %372 = vperm.xlu1 %2251, %v2465_v11   ;;  %367 = vperm.xlu0 %2250, %v2468_v12  }
  0x2c   : > { %382 = vperm.xlu1 %2251, %v2473_v13   ;;  %377 = vperm.xlu0 %2250, %v2476_v14  }
  0x30   : > { %392 = vperm.xlu1 %2251, %v2481_v15   ;;  %387 = vperm.xlu0 %2250, %v2484_v16  }
  0x34   : > { %402 = vperm.xlu1 %2251, %v2489_v17   ;;  %397 = vperm.xlu0 %2250, %v2492_v18  }
  0x38   : > { %412 = vperm.xlu1 %2251, %v2497_v19   ;;  %407 = vperm.xlu0 %2250, %v2500_v20  }
  0x3c   : > { %422 = vperm.xlu1 %2251, %v2505_v21   ;;  %417 = vperm.xlu0 %2250, %v2508_v22  }
  0x40   : > { %432 = vperm.xlu1 %2251, %v2513_v23   ;;  %427 = vperm.xlu0 %2250, %v2516_v24  }
  0x44   : > { %442 = vperm.xlu1 %2251, %v2521_v25   ;;  %437 = vperm.xlu0 %2250, %v2524_v26  }
  0x48   : > { %452 = vperm.xlu1 %2251, %v2529_v27   ;;  %447 = vperm.xlu0 %2250, %v2532_v28  }
  0x4c   : > { %462 = vperm.xlu1 %2251, %v2537_v29   ;;  %457 = vperm.xlu0 %2250, %v2540_v30  }
  0x50   : > { %472 = vperm.xlu1 %2251, %v2545_v31   ;;  %467 = vperm.xlu0 %2250, %v2548_v32  }
  0x54   : > { %2253 = vset.pattern.permute.xlu1 %v3692_v33  ;;  %2252 = vset.pattern.permute.xlu0 %v3692_v33 }
  0x55   : > { %516 = vperm.xlu1 %2253, %v2436_v4   ;;  %512 = vperm.xlu0 %2252, %v2428_v2  }
  0x59   : > { %520 = vperm.xlu1 %2253, %v2425_v1   ;;  %524 = vperm.xlu0 %2252, %v2433_v3  }
  0x5d   : > { %528 = vperm.xlu1 %2253, %v2444_v6   ;;  %532 = vperm.xlu0 %2252, %v2441_v5  }
  0x61   : > { %536 = vperm.xlu1 %2253, %v2452_v8   ;;  %540 = vperm.xlu0 %2252, %v2449_v7  }
  0x65   : > { %576 = vperm.xlu1 %2253, %v2492_v18   ;;  %580 = vperm.xlu0 %2252, %v2489_v17  }
  0x69   : > { %2254 = vset.pattern.permute.xlu1 %v3688_v34  ;;  %584 = vperm.xlu0 %2252, %v2500_v20  }
  0x6a   : > { %708 = vperm.xlu1 %2254, %v2428_v2  }
  0x6d   : > { %588 = vperm.xlu0 %2252, %v2497_v19  }
  0x6e   : > { %712 = vperm.xlu1 %2254, %v2436_v4  }
  0x71   : > { %608 = vperm.xlu0 %2252, %v2524_v26  }
  0x72   : > { %776 = vperm.xlu1 %2254, %v2489_v17  }
  0x75   : > { %548 = vperm.xlu0 %2252, %v2457_v9  }
  0x76   : > { %2255 = vset.pattern.permute.xlu1 %v3690_v35 }
  0x77   : > { %904 = vperm.xlu1 %2255, %v2428_v2  }
  0x79   : > { %552 = vperm.xlu0 %2252, %v2468_v12  }
  0x7b   : > { %968 = vperm.xlu1 %2255, %v2492_v18  }
  0x7d   : > { %624 = vperm.xlu0 %2252, %v2540_v30  }
  0x7f   : > { %908 = vperm.xlu1 %2255, %v2436_v4  }
  0x81   : > { %564 = vperm.xlu0 %2252, %v2473_v13  }
  0x83   : > { %2256 = vset.pattern.permute.xlu1 %v3688_v34 }
  0x84   : > { %716 = vperm.xlu1 %2256, %v2425_v1  }
  0x85   : > { %568 = vperm.xlu0 %2252, %v2484_v16  }
  0x88   : > { %780 = vperm.xlu1 %2256, %v2500_v20  }
  0x89   : > { %2282 = vset.pattern.permute.xlu0 %v3688_v34 }
  0x8a   : > { %772 = vperm.xlu0 %2282, %v2492_v18  }
  0x8c   : > { %784 = vperm.xlu1 %2256, %v2497_v19  }
  0x8e   : > { %720 = vperm.xlu0 %2282, %v2433_v3  }
  0x90   : > { %2257 = vset.pattern.permute.xlu1 %v3692_v33 }
  0x91   : > { %592 = vperm.xlu1 %2257, %v2508_v22  }
  0x92   : > { %724 = vperm.xlu0 %2282, %v2444_v6  }
  0x93   : > { %v2590_v36 = vpop.permute.xlu1 %327  ;;  %v2592_v37 = vpop.permute.xlu0 %317 }
  0x95   : > { %2258 = vset.pattern.permute.xlu1 %v3690_v35 }
  0x96   : > { %976 = vperm.xlu1 %2258, %v2500_v20   ;;  %792 = vperm.xlu0 %2282, %v2505_v21  }
  0x97   : > { %v2597_v38 = vpop.permute.xlu1 %332  ;;  %v2599_v39 = vpop.permute.xlu0 %322 }
  0x9a   : > { %2259 = vset.pattern.permute.xlu1 %v3692_v33  ;;  %732 = vperm.xlu0 %2282, %v2452_v8  }
  0x9b   : > { %v2603_v40 = vpop.permute.xlu1 %342  ;;  %596 = vperm.xlu1 %2259, %v2505_v21   ;;  %v2606_v41 = vpop.permute.xlu0 %337 }
  0x9c   : > { %3696 = vst [vmem:[#allocation2_spill] sm:$0xff] %v2603_v40 }
  0x9e   : > { %800 = vperm.xlu0 %2282, %v2513_v23  }
  0x9f   : > { %v2609_v42 = vpop.permute.xlu1 %352  ;;  %2260 = vset.pattern.permute.xlu1 %v3690_v35  ;;  %v2612_v43 = vpop.permute.xlu0 %347 }
  0xa0   : > { %3697 = vst [vmem:[#allocation3_spill] sm:$0xff] %v2609_v42  ;;  %3698 = vst [vmem:[#allocation4_spill] sm:$0xff] %v2612_v43  ;;  %980 = vperm.xlu1 %2260, %v2497_v19  }
  0xa2   : > { %804 = vperm.xlu0 %2282, %v2524_v26  }
  0xa3   : > { %v2616_v44 = vpop.permute.xlu1 %362  ;;  %v2618_v45 = vpop.permute.xlu0 %357 }
  0xa4   : > { %3699 = vst [vmem:[#allocation5_spill] sm:$0xff] %v2616_v44  ;;  %3700 = vst [vmem:[#allocation6_spill] sm:$0xff] %v2618_v45  ;;  %2261 = vset.pattern.permute.xlu1 %v3688_v34  ;;  %v3717_v44 = vmov 3  }
  0xa5   : > { %788 = vperm.xlu1 %2261, %v2508_v22  }
  0xa6   : > { %748 = vperm.xlu0 %2282, %v2468_v12  }
  0xa7   : > { %v2623_v46 = vpop.permute.xlu1 %372  ;;  %v2625_v47 = vpop.permute.xlu0 %367 }
  0xa8   : > { %3701 = vst [vmem:[#allocation7_spill] sm:$0xff] %v2623_v46  ;;  %3702 = vst [vmem:[#allocation8_spill] sm:$0xff] %v2625_v47 }
  0xa9   : > { %728 = vperm.xlu1 %2261, %v2441_v5  }
  0xaa   : > { %816 = vperm.xlu0 %2282, %v2529_v27  }
  0xab   : > { %v2629_v48 = vpop.permute.xlu1 %382  ;;  %v2631_v49 = vpop.permute.xlu0 %377 }
  0xac   : > { %3703 = vst [vmem:[#allocation9_spill] sm:$0xff] %v2629_v48  ;;  %3704 = vst [vmem:[#allocation10_spill] sm:$0xff] %v2631_v49 }
  0xad   : > { %2262 = vset.pattern.permute.xlu1 %v3692_v33 }
  0xae   : > { %600 = vperm.xlu1 %2262, %v2516_v24   ;;  %820 = vperm.xlu0 %2282, %v2540_v30  }
  0xaf   : > { %v2636_v50 = vpop.permute.xlu1 %392  ;;  %v2638_v51 = vpop.permute.xlu0 %387 }
  0xb0   : > { %3705 = vst [vmem:[#allocation11_spill] sm:$0xff] %v2636_v50  ;;  %v314_v50 = vld [vmem:[%s3681_s1] sm:$0xf] }
  0xb2   : > { %2263 = vset.pattern.permute.xlu1 %v3690_v35  ;;  %764 = vperm.xlu0 %2282, %v2484_v16  }
  0xb3   : > { %v2642_v52 = vpop.permute.xlu1 %402  ;;  %984 = vperm.xlu1 %2263, %v2508_v22   ;;  %v2645_v53 = vpop.permute.xlu0 %397  ;;  %v475_v22 = vlaneseq }
  0xb6   : > { %832 = vperm.xlu0 %2282, %v2545_v31  }
  0xb7   : > { %v2648_v54 = vpop.permute.xlu1 %412  ;;  %2264 = vset.pattern.permute.xlu1 %v3692_v33  ;;  %v2651_v55 = vpop.permute.xlu0 %407 }
  0xb8   : > { %604 = vperm.xlu1 %2264, %v2513_v23  }
  0xba   : > { %2288 = vset.pattern.permute.xlu0 %v3690_v35 }
  0xbb   : > { %v2655_v56 = vpop.permute.xlu1 %422  ;;  %972 = vperm.xlu0 %2288, %v2489_v17   ;;  %v2658_v57 = vpop.permute.xlu0 %417 }
  0xbc   : > { %2265 = vset.pattern.permute.xlu1 %v3690_v35 }
  0xbd   : > { %988 = vperm.xlu1 %2265, %v2505_v21  }
  0xbf   : > { %v2662_v58 = vpop.permute.xlu1 %432  ;;  %912 = vperm.xlu0 %2288, %v2425_v1   ;;  %v2665_v59 = vpop.permute.xlu0 %427 }
  0xc1   : > { %2266 = vset.pattern.permute.xlu1 %v3688_v34 }
  0xc2   : > { %796 = vperm.xlu1 %2266, %v2516_v24  }
  0xc3   : > { %v2669_v60 = vpop.permute.xlu1 %442  ;;  %916 = vperm.xlu0 %2288, %v2433_v3   ;;  %v2672_v61 = vpop.permute.xlu0 %437 }
  0xc4   : > { %3706 = vst [vmem:[#allocation12_spill] sm:$0xff] %v2669_v60 }
  0xc6   : > { %736 = vperm.xlu1 %2266, %v2449_v7  }
  0xc7   : > { %v2675_v62 = vpop.permute.xlu1 %452  ;;  %920 = vperm.xlu0 %2288, %v2444_v6   ;;  %v2678_v63 = vpop.permute.xlu0 %447 }
  0xc8   : > { %3707 = vst [vmem:[#allocation13_spill] sm:$0xff] %v2675_v62  ;;  %3708 = vst [vmem:[#allocation14_spill] sm:$0xff] %v2678_v63 }
  0xca   : > { %2267 = vset.pattern.permute.xlu1 %v3692_v33 }
  0xcb   : > { %v2681_v0 = vpop.permute.xlu1 %462  ;;  %544 = vperm.xlu1 %2267, %v2460_v10   ;;  %924 = vperm.xlu0 %2288, %v2441_v5   ;;  %v2685_v1 = vpop.permute.xlu0 %457 }
  0xcc   : > { %3709 = vst [vmem:[#allocation15_spill] sm:$0xff] %v2681_v0  ;;  %v3716_v0 = vmov 1  }
  0xcf   : > { %v2687_v2 = vpop.permute.xlu1 %472  ;;  %2268 = vset.pattern.permute.xlu1 %v3690_v35  ;;  %932 = vperm.xlu0 %2288, %v2449_v7   ;;  %v2691_v3 = vpop.permute.xlu0 %467 }
  0xd0   : > { %3710 = vst [vmem:[#allocation16_spill] sm:$0xff] %v2687_v2  ;;  %3711 = vst [vmem:[#allocation17_spill] sm:$0xff] %v2691_v3  ;;  %928 = vperm.xlu1 %2268, %v2452_v8  }
  0xd3   : > { %1000 = vperm.xlu0 %2288, %v2524_v26  }
  0xd4   : > { %v517_v4 = vpop.permute.xlu1 %516  ;;  %992 = vperm.xlu1 %2268, %v2516_v24   ;;  %v513_v6 = vpop.permute.xlu0 %512  ;;  %v476_v24 = vshrl.u32 %v475_v22, 7 }
  0xd6   : > { %v837_v3 = vsub.s32 2, %v476_v24  ;;  %v1033_v48 = vsub.s32 3, %v476_v24 }
  0xd7   : > { %940 = vperm.xlu0 %2288, %v2457_v9  }
  0xd8   : > { %v2697_v5 = vpop.permute.xlu1 %520  ;;  %2269 = vset.pattern.permute.xlu1 %v3692_v33  ;;  %v2700_v17 = vpop.permute.xlu0 %524  ;;  %v2745_v47 = vrot.slane %v314_v50, %v837_v3 }
  0xd9   : > { %612 = vperm.xlu1 %2269, %v2521_v25  }
  0xdb   : > { %948 = vperm.xlu0 %2288, %v2465_v11  }
  0xdc   : > { %v2704_v7 = vpop.permute.xlu1 %528  ;;  %v2706_v8 = vpop.permute.xlu0 %532 }
  0xdd   : > { %3712 = vst [vmem:[#allocation18_spill] sm:$0xff] %v2704_v7  ;;  %3713 = vst [vmem:[#allocation19_spill] sm:$0xff] %v2706_v8  ;;  %2270 = vset.pattern.permute.xlu1 %v3690_v35  ;;  %v641_v35 = vsub.s32 1, %v476_v24 }
  0xde   : > { %996 = vperm.xlu1 %2270, %v2513_v23  }
  0xdf   : > { %1016 = vperm.xlu0 %2288, %v2540_v30   ;;  %v2738_v2 = vrot.slane %v314_v50, %v641_v35 }
  0xe0   : > { %v2711_v18 = vpop.permute.xlu1 %536  ;;  %v2713_v19 = vpop.permute.xlu0 %540 }
  0xe1   : > { %3714 = vst [vmem:[#allocation20_spill] sm:$0xff] %v2711_v18  ;;  %3715 = vst [vmem:[#allocation21_spill] sm:$0xff] %v2713_v19  ;;  %v643_v63 = vmul.f32 %v2738_v2, %v513_v6  ;;  %v644_v3 = vmul.f32 %v2738_v2, %v517_v4 }
  0xe2   : > { %2271 = vset.pattern.permute.xlu1 %v3688_v34  ;;  %v477_v34 = vsub.s32 0, %v476_v24 }
  0xe3   : > { %740 = vperm.xlu1 %2271, %v2460_v10   ;;  %956 = vperm.xlu0 %2288, %v2473_v13  }
  0xe4   : > { %v2718_v20 = vpop.permute.xlu1 %576  ;;  %v2720_v21 = vpop.permute.xlu0 %580  ;;  %v2736_v22 = vrot.slane %v314_v50, %v477_v34  ;;  %v2751_v34 = vrot.slane %v314_v50, %v1033_v48 }
  0xe6   : > { %v479_v46 = vmul.f32 %v2736_v22, %v2592_v37  ;;  %v480_v37 = vmul.f32 %v2736_v22, %v2599_v39  ;;  %v2769_v39 = vld [vmem:[%s3682_s2] ss:$0 sm:$0xff]  ;;  %v507_v43 = vmul.f32 %v2736_v22, %v2685_v1 }
  0xe7   : > { %744 = vperm.xlu1 %2271, %v2457_v9   ;;  %1024 = vperm.xlu0 %2288, %v2548_v32  }
  0xe8   : > { %v2724_v23 = vpop.permute.xlu0 %584  ;;  %v675_v42 = vadd.f32 %v643_v63, %v479_v46  ;;  %v676_v63 = vadd.f32 %v644_v3, %v480_v37 }
  0xe9   : > { %v709_v26 = vpop.permute.xlu1 %708 }
  0xea   : > { %v839_v19 = vmul.f32 %v2745_v47, %v709_v26 }
  0xeb   : > { %808 = vperm.xlu1 %2271, %v2521_v25  }
  0xec   : > { %v2727_v30 = vpop.permute.xlu0 %588  ;;  %v871_v48 = vadd.f32 %v839_v19, %v675_v42 }
  0xed   : > { %v713_v33 = vpop.permute.xlu1 %712 }
  0xee   : > { %v840_v46 = vmul.f32 %v2745_v47, %v713_v33 }
  0xef   : > { %2272 = vset.pattern.permute.xlu1 %v3716_v0 }
  0xf0   : > { %616 = vperm.xlu1 %2272, %v2532_v28   ;;  %v2734_v9 = vpop.permute.xlu0 %608  ;;  %v872_v4 = vadd.f32 %v840_v46, %v676_v63 }
  0xf1   : > { %v2740_v49 = vpop.permute.xlu1 %776 }
  0xf4   : > { %2273 = vset.pattern.permute.xlu1 %v3717_v44  ;;  %v2748_v45 = vpop.permute.xlu0 %548 }
  0xf5   : > { %3718 = vst [vmem:[#allocation22_spill] sm:$0xff] %v2748_v45  ;;  %936 = vperm.xlu1 %2273, %v2460_v10  }
  0xf6   : > { %v905_v35 = vpop.permute.xlu1 %904 }
  0xf7   : > { %v1035_v6 = vmul.f32 %v2751_v34, %v905_v35 }
  0xf8   : > { %v2754_v24 = vpop.permute.xlu0 %552 }
  0xf9   : > { %3719 = vst [vmem:[#allocation23_spill] sm:$0xff] %v2754_v24  ;;  %2274 = vset.pattern.permute.xlu1 %v3716_v0  ;;  %v1067_v26 = vadd.f32 %v1035_v6, %v871_v48 }
  0xfa   : > { %556 = vperm.xlu1 %2274, %v2465_v11   ;;  %v2762_v10 = vpop.permute.xlu1 %968 }
  0xfb   : > { %v2775_v42 = vadd.f32 %v2769_v39, %v1067_v26 }
  0xfc   : > { %v625_v50 = vpop.permute.xlu0 %624 }
  0xfd   : > { %3721 = vst [vmem:[#allocation25_spill] sm:$0xff] %v2775_v42  ;;  %v1139_v37 = vsel %vm1138_vm0, %v2775_v42, 0.0  ;;  %v671_v40 = vmul.f32 %v2738_v2, %v625_v50 }
  0xfe   : > { %620 = vperm.xlu1 %2274, %v2529_v27   ;;  %v909_v24 = vpop.permute.xlu1 %908 }
  0xff   : > { %v1036_v35 = vmul.f32 %v2751_v34, %v909_v24  ;;  %v3723_v24 = vmov 2  }
 0x100   : > { %v2772_v45 = vpop.permute.xlu0 %564 }
 0x101   : > { %3720 = vst [vmem:[#allocation24_spill] sm:$0xff] %v2772_v45  ;;  %v1068_v18 = vadd.f32 %v1036_v35, %v872_v4 }
 0x102   : > { %2275 = vset.pattern.permute.xlu1 %v3717_v44 }
 0x103   : > { %1004 = vperm.xlu1 %2275, %v2521_v25   ;;  %v2779_v33 = vpop.permute.xlu1 %716  ;;  %v2784_v3 = vadd.f32 %v2769_v39, %v1068_v18 }
 0x104   : > { %v569_v19 = vpop.permute.xlu0 %568 }
 0x105   : > { %3722 = vst [vmem:[#allocation26_spill] sm:$0xff] %v2784_v3  ;;  %v1142_v25 = vsel %vm1138_vm0, %v2784_v3, 0.0 }
 0x106   : > { %1140 = vadd.xlane.f32.xlu0 %v1139_v37 }
 0x107   : > { %2276 = vset.pattern.permute.xlu1 %v3723_v24  ;;  %v781_v6 = vpop.permute.xlu1 %780 }
 0x108   : > { %812 = vperm.xlu1 %2276, %v2532_v28  }
 0x109   : > { %v2788_v48 = vpop.permute.xlu0 %772 }
 0x10a   : > { %1143 = vadd.xlane.f32.xlu0 %v1142_v25 }
 0x10b   : > { %v785_v46 = vpop.permute.xlu1 %784 }
 0x10c   : > { %752 = vperm.xlu1 %2276, %v2465_v11  }
 0x10d   : > { %v2793_v63 = vpop.permute.xlu0 %720 }
 0x110   : > { %2277 = vset.pattern.permute.xlu1 %v3716_v0  ;;  %v593_v18 = vpop.permute.xlu1 %592 }
 0x111   : > { %560 = vperm.xlu1 %2277, %v2476_v14   ;;  %v2797_v26 = vpop.permute.xlu0 %724 }
 0x112   : > { %3724 = vst [vmem:[#allocation27_spill] sm:$0xff] %v2797_v26  ;;  %v703_v26 = vadd.f32 %v671_v40, %v507_v43  ;;  %v497_v40 = vmul.f32 %v2736_v22, %v2651_v55  ;;  %v660_v43 = vmul.f32 %v2738_v2, %v2720_v21  ;;  %v857_v55 = vmul.f32 %v2745_v47, %v781_v6 }
 0x115   : > { %2278 = vset.pattern.permute.xlu1 %v3717_v44  ;;  %v977_v4 = vpop.permute.xlu1 %976  ;;  %v2800_v35 = vpop.permute.xlu0 %792 }
 0x116   : > { %944 = vperm.xlu1 %2278, %v2468_v12  }
 0x119   : > { %v2803_v37 = vpop.permute.xlu0 %732 }
 0x11a   : > { %3725 = vst [vmem:[#allocation28_spill] sm:$0xff] %v2803_v37  ;;  %1008 = vperm.xlu1 %2278, %v2532_v28   ;;  %v597_v11 = vpop.permute.xlu1 %596 }
 0x11d   : > { %v2806_v25 = vpop.permute.xlu0 %800 }
 0x11e   : > { %2279 = vset.pattern.permute.xlu1 %v3716_v0 }
 0x11f   : > { %628 = vperm.xlu1 %2279, %v2537_v29   ;;  %v981_v3 = vpop.permute.xlu1 %980 }
 0x121   : > { %v2810_v42 = vpop.permute.xlu0 %804 }
 0x123   : > { %2280 = vset.pattern.permute.xlu1 %v3717_v44 }
 0x124   : > { %1012 = vperm.xlu1 %2280, %v2529_v27   ;;  %v789_v45 = vpop.permute.xlu1 %788 }
 0x125   : > { %v2814_v12 = vpop.permute.xlu0 %748 }
 0x126   : > { %3726 = vst [vmem:[#allocation29_spill] sm:$0xff] %v2814_v12  ;;  %v657_v12 = vmul.f32 %v2738_v2, %v569_v19  ;;  %v496_v19 = vmul.f32 %v2736_v22, %v2642_v52 }
 0x128   : > { %2281 = vset.pattern.permute.xlu1 %v3723_v24  ;;  %v2817_v28 = vpop.permute.xlu1 %728  ;;  %v692_v21 = vadd.f32 %v660_v43, %v496_v19 }
 0x129   : > { %3727 = vst [vmem:[#allocation30_spill] sm:$0xff] %v2817_v28  ;;  %756 = vperm.xlu1 %2281, %v2476_v14   ;;  %v2820_v37 = vpop.permute.xlu0 %816  ;;  %v493_v28 = vmul.f32 %v2736_v22, %v2638_v51  ;;  %v661_v51 = vmul.f32 %v2738_v2, %v2724_v23  ;;  %v662_v23 = vmul.f32 %v2738_v2, %v2727_v30 }
 0x12a   : > { %3728 = vst [vmem:[#allocation31_spill] sm:$0xff] %v2820_v37 }
 0x12b   : > { %v689_v37 = vadd.f32 %v657_v12, %v493_v28  ;;  %v693_v12 = vadd.f32 %v661_v51, %v497_v40  ;;  %v1053_v28 = vmul.f32 %v2751_v34, %v977_v4  ;;  %v663_v40 = vmul.f32 %v2738_v2, %v593_v18 }
 0x12c   : > { %v1054_v4 = vmul.f32 %v2751_v34, %v981_v3  ;;  %v500_v18 = vmul.f32 %v2736_v22, %v2655_v56 }
 0x12d   : > { %760 = vperm.xlu1 %2281, %v2473_v13   ;;  %v2826_v8 = vpop.permute.xlu1 %600  ;;  %v821_v27 = vpop.permute.xlu0 %820 }
 0x12e   : > { %v867_v60 = vmul.f32 %v2745_v47, %v821_v27  ;;  %v498_v27 = vmul.f32 %v2736_v22, %v2648_v54  ;;  %v499_v54 = vmul.f32 %v2736_v22, %v2658_v57 }
 0x130   : > { %v2832_v7 = vadd.f32 %v867_v60, %v703_v26  ;;  %v856_v26 = vmul.f32 %v2745_v47, %v2740_v49  ;;  %v858_v49 = vmul.f32 %v2745_v47, %v785_v46  ;;  %v694_v30 = vadd.f32 %v662_v23, %v498_v27 }
 0x131   : > { %824 = vperm.xlu1 %2281, %v2537_v29   ;;  %v765_v1 = vpop.permute.xlu0 %764  ;;  %v664_v46 = vmul.f32 %v2738_v2, %v597_v11  ;;  %v695_v3 = vadd.f32 %v663_v40, %v499_v54  ;;  %v860_v23 = vmul.f32 %v2745_v47, %v2800_v35 }
 0x132   : > { %v853_v50 = vmul.f32 %v2745_v47, %v765_v1  ;;  %v985_v13 = vpop.permute.xlu1 %984  ;;  %v888_v1 = vadd.f32 %v856_v26, %v692_v21  ;;  %v890_v26 = vadd.f32 %v858_v49, %v694_v30 }
 0x133   : > { %v1055_v57 = vmul.f32 %v2751_v34, %v985_v13  ;;  %v696_v56 = vadd.f32 %v664_v46, %v500_v18 }
 0x134   : > { %v2836_v62 = vadd.f32 %v853_v50, %v689_v37  ;;  %v889_v50 = vadd.f32 %v857_v55, %v693_v12  ;;  %v859_v55 = vmul.f32 %v2745_v47, %v789_v45  ;;  %v1086_v21 = vadd.f32 %v1054_v4, %v890_v26 }
 0x135   : > { %2283 = vset.pattern.permute.xlu1 %v3716_v0  ;;  %v2845_v60 = vpop.permute.xlu0 %832  ;;  %v892_v49 = vadd.f32 %v860_v23, %v696_v56  ;;  %v501_v26 = vmul.f32 %v2736_v22, %v2665_v59  ;;  %v502_v59 = vmul.f32 %v2736_v22, %v2662_v58 }
 0x136   : > { %3729 = vst [vmem:[#allocation32_spill] sm:$0xff] %v2836_v62  ;;  %632 = vperm.xlu1 %2283, %v2548_v32   ;;  %v1085_v51 = vadd.f32 %v1053_v28, %v889_v50  ;;  %v891_v28 = vadd.f32 %v859_v55, %v695_v3  ;;  %v2896_v50 = vadd.f32 %v2769_v39, %v1086_v21 }
 0x137   : > { %v2853_v37 = vpop.permute.xlu1 %604 }
 0x138   : > { %v2883_v45 = vadd.f32 %v2769_v39, %v1085_v51  ;;  %v1087_v27 = vadd.f32 %v1055_v57, %v891_v28  ;;  %v1196_v40 = vsel %vm1138_vm0, %v2896_v50, 0.0  ;;  %v666_v21 = vmul.f32 %v2738_v2, %v2853_v37 }
 0x139   : > { %v862_v37 = vmul.f32 %v2745_v47, %v2806_v25 }
 0x13a   : > { %2284 = vset.pattern.permute.xlu1 %v3717_v44  ;;  %v973_v52 = vpop.permute.xlu0 %972 }
 0x13b   : > { %v1052_v6 = vmul.f32 %v2751_v34, %v973_v52  ;;  %952 = vperm.xlu1 %2284, %v2476_v14  }
 0x13c   : > { %v989_v43 = vpop.permute.xlu1 %988 }
 0x13d   : > { %v1084_v19 = vadd.f32 %v1052_v6, %v888_v1  ;;  %v1056_v13 = vmul.f32 %v2751_v34, %v989_v43  ;;  %v1193_v1 = vsel %vm1138_vm0, %v2883_v45, 0.0  ;;  %v2905_v43 = vadd.f32 %v2769_v39, %v1087_v27 }
 0x13e   : > { %v2868_v62 = vpop.permute.xlu0 %912 }
 0x13f   : > { %2285 = vset.pattern.permute.xlu1 %v3716_v0  ;;  %v2874_v14 = vadd.f32 %v2769_v39, %v1084_v19  ;;  %v1088_v35 = vadd.f32 %v1056_v13, %v892_v49  ;;  %v1199_v4 = vsel %vm1138_vm0, %v2905_v43, 0.0 }
 0x140   : > { %572 = vperm.xlu1 %2285, %v2481_v15  }
 0x141   : > { %v797_v12 = vpop.permute.xlu1 %796  ;;  %v1190_v11 = vsel %vm1138_vm0, %v2874_v14, 0.0  ;;  %v2915_v19 = vadd.f32 %v2769_v39, %v1088_v35 }
 0x142   : > { %1191 = vadd.xlane.f32.xlu0 %v1190_v11  ;;  %v2885_v0 = vpop.permute.xlu0 %916  ;;  %v861_v46 = vmul.f32 %v2745_v47, %v797_v12  ;;  %v503_v12 = vmul.f32 %v2736_v22, %v2672_v61  ;;  %v667_v11 = vmul.f32 %v2738_v2, %v2734_v9 }
 0x144   : > { %636 = vperm.xlu1 %2285, %v2545_v31   ;;  %v699_v61 = vadd.f32 %v667_v11, %v503_v12 }
 0x145   : > { %v2891_v52 = vpop.permute.xlu1 %736 }
 0x146   : > { %1194 = vadd.xlane.f32.xlu0 %v1193_v1  ;;  %v2898_v6 = vpop.permute.xlu0 %920 }
 0x148   : > { %2286 = vset.pattern.permute.xlu1 %v3717_v44 }
 0x149   : > { %1020 = vperm.xlu1 %2286, %v2537_v29   ;;  %v665_v29 = vmul.f32 %v2738_v2, %v2826_v8 }
 0x14a   : > { %v2907_v30 = vpop.permute.xlu1 %544  ;;  %1197 = vadd.xlane.f32.xlu0 %v1196_v40  ;;  %v2909_v51 = vpop.permute.xlu0 %924 }
 0x14b   : > { %v697_v55 = vadd.f32 %v665_v29, %v501_v26 }
 0x14d   : > { %2287 = vset.pattern.permute.xlu1 %v3723_v24  ;;  %v1202_v24 = vsel %vm1138_vm0, %v2915_v19, 0.0  ;;  %v893_v3 = vadd.f32 %v861_v46, %v697_v55  ;;  %v495_v46 = vmul.f32 %v2736_v22, %v2645_v53  ;;  %v481_v53 = vmul.f32 %v2736_v22, %v2590_v36 }
 0x14e   : > { %828 = vperm.xlu1 %2287, %v2548_v32   ;;  %1200 = vadd.xlane.f32.xlu0 %v1199_v4  ;;  %v2928_v18 = vpop.permute.xlu0 %932 }
 0x14f   : > { %v2920_v54 = vpop.permute.xlu1 %928 }
 0x152   : > { %768 = vperm.xlu1 %2287, %v2481_v15   ;;  %1203 = vadd.xlane.f32.xlu0 %v1202_v24  ;;  %v1001_v28 = vpop.permute.xlu0 %1000  ;;  %v659_v24 = vmul.f32 %v2738_v2, %v2718_v20  ;;  %v841_v20 = vmul.f32 %v2745_v47, %v2779_v33  ;;  %v842_v33 = vmul.f32 %v2745_v47, %v2793_v63  ;;  %v3732_v63 = vld [vmem:[#allocation12_spill] sm:$0xff] }
 0x153   : > { %v993_v8 = vpop.permute.xlu1 %992  ;;  %v1059_v9 = vmul.f32 %v2751_v34, %v1001_v28  ;;  %v646_v28 = vmul.f32 %v2738_v2, %v2700_v17 }
 0x154   : > { %v1057_v32 = vmul.f32 %v2751_v34, %v993_v8  ;;  %v855_v8 = vmul.f32 %v2745_v47, %v2788_v48 }
 0x156   : > { %v1089_v57 = vadd.f32 %v1057_v32, %v893_v3  ;;  %2289 = vset.pattern.permute.xlu1 %v3717_v44  ;;  %v698_v44 = vadd.f32 %v666_v21, %v502_v59  ;;  %v691_v3 = vadd.f32 %v659_v24, %v495_v46  ;;  %v1051_v59 = vmul.f32 %v2751_v34, %v2762_v10 }
 0x157   : > { %960 = vperm.xlu1 %2289, %v2484_v16   ;;  %v863_v16 = vmul.f32 %v2745_v47, %v2810_v42  ;;  %v483_v10 = vmul.f32 %v2736_v22, %v2606_v41  ;;  %v1038_v41 = vmul.f32 %v2751_v34, %v2885_v0 }
 0x158   : > { %v613_v23 = vpop.permute.xlu1 %612  ;;  %v2942_v56 = vadd.f32 %v2769_v39, %v1089_v57  ;;  %v894_v1 = vadd.f32 %v862_v37, %v698_v44  ;;  %v887_v21 = vadd.f32 %v855_v8, %v691_v3  ;;  %v645_v57 = vmul.f32 %v2738_v2, %v2697_v5  ;;  %v3735_v8 = vld [vmem:[#allocation19_spill] sm:$0xff] }
 0x159   : > { %v895_v13 = vadd.f32 %v863_v16, %v699_v61  ;;  %v1037_v37 = vmul.f32 %v2751_v34, %v2868_v62  ;;  %v482_v5 = vmul.f32 %v2736_v22, %v2597_v38  ;;  %v3730_v16 = vld [vmem:[#allocation13_spill] sm:$0xff]  ;;  %v668_v17 = vmul.f32 %v2738_v2, %v613_v23 }
 0x15a   : > { %v1205_v58 = vsel %vm1138_vm0, %v2942_v56, 0.0  ;;  %v1083_v11 = vadd.f32 %v1051_v59, %v887_v21  ;;  %v677_v48 = vadd.f32 %v645_v57, %v481_v53  ;;  %v506_v44 = vmul.f32 %v2736_v22, %v3730_v16 }
 0x15b   : > { %964 = vperm.xlu1 %2289, %v2481_v15   ;;  %1206 = vadd.xlane.f32.xlu0 %v1205_v58  ;;  %v1091_v25 = vadd.f32 %v1059_v9, %v895_v13  ;;  %v3731_v58 = vld [vmem:[#allocation18_spill] sm:$0xff]  ;;  %v678_v38 = vadd.f32 %v646_v28, %v482_v5  ;;  %v648_v3 = vmul.f32 %v2738_v2, %v3735_v8  ;;  %v3742_v8 = vld [vmem:[#allocation3_spill] sm:$0xff] }
 0x15c   : > { %v873_v36 = vadd.f32 %v841_v20, %v677_v48  ;;  %v647_v61 = vmul.f32 %v2738_v2, %v3731_v58  ;;  %v3004_v62 = vadd.f32 %v2769_v39, %v1083_v11  ;;  %v3736_v11 = vld [vmem:[#allocation2_spill] sm:$0xff] }
 0x15d   : > { %v997_v27 = vpop.permute.xlu1 %996  ;;  %v2962_v4 = vadd.f32 %v2769_v39, %v1091_v25  ;;  %v874_v25 = vadd.f32 %v842_v33, %v678_v38  ;;  %v484_v48 = vmul.f32 %v2736_v22, %v3736_v11  ;;  %v3738_v33 = vld [vmem:[#allocation4_spill] sm:$0xff] }
 0x15e   : > { %v1058_v49 = vmul.f32 %v2751_v34, %v997_v27  ;;  %v1069_v27 = vadd.f32 %v1037_v37, %v873_v36  ;;  %v679_v24 = vadd.f32 %v647_v61, %v483_v10  ;;  %v1187_v21 = vsel %vm1138_vm0, %v3004_v62, 0.0  ;;  %v3737_v10 = vld [vmem:[#allocation30_spill] sm:$0xff] }
 0x15f   : > { %1028 = vperm.xlu1 %2289, %v2545_v31   ;;  %v1211_v26 = vsel %vm1138_vm0, %v2962_v4, 0.0  ;;  %v1070_v57 = vadd.f32 %v1038_v41, %v874_v25  ;;  %v844_v36 = vmul.f32 %v2745_v47, %v3737_v10  ;;  %v680_v16 = vadd.f32 %v648_v3, %v484_v48 }
 0x160   : > { %v1090_v35 = vadd.f32 %v1058_v49, %v894_v1  ;;  %v504_v1 = vmul.f32 %v2736_v22, %v3732_v63  ;;  %v3023_v53 = vadd.f32 %v2769_v39, %v1069_v27  ;;  %v3740_v63 = vld [vmem:[#allocation28_spill] sm:$0xff]  ;;  %v486_v3 = vmul.f32 %v2736_v22, %v3742_v8 }
 0x161   : > { %v3041_v27 = vadd.f32 %v2769_v39, %v1070_v57 }
 0x162   : > { %v2954_v42 = vpop.permute.xlu1 %740  ;;  %v2957_v40 = vadd.f32 %v2769_v39, %v1090_v35  ;;  %v3733_v35 = vld [vmem:[#allocation27_spill] sm:$0xff]  ;;  %v700_v0 = vadd.f32 %v668_v17, %v504_v1  ;;  %v1145_v38 = vsel %vm1138_vm0, %v3023_v53, 0.0  ;;  %v845_v1 = vmul.f32 %v2745_v47, %v3740_v63 }
 0x163   : > { %v843_v23 = vmul.f32 %v2745_v47, %v3733_v35  ;;  %v3741_v35 = vld [vmem:[#allocation21_spill] sm:$0xff] }
 0x164   : > { %v1208_v15 = vsel %vm1138_vm0, %v2957_v40, 0.0 }
 0x165   : > { %1209 = vadd.xlane.f32.xlu0 %v1208_v15  ;;  %v3734_v15 = vld [vmem:[#allocation31_spill] sm:$0xff]  ;;  %v875_v5 = vadd.f32 %v843_v23, %v679_v24  ;;  %v650_v23 = vmul.f32 %v2738_v2, %v3741_v35 }
 0x166   : > { %v2964_v29 = vpop.permute.xlu1 %744 }
 0x169   : > { %1212 = vadd.xlane.f32.xlu0 %v1211_v26  ;;  %v866_v26 = vmul.f32 %v2745_v47, %v3734_v15 }
 0x16a   : > { %v809_v31 = vpop.permute.xlu1 %808 }
 0x16b   : > { %v864_v49 = vmul.f32 %v2745_v47, %v809_v31  ;;  %v1039_v31 = vmul.f32 %v2751_v34, %v2898_v6  ;;  %v485_v6 = vmul.f32 %v2736_v22, %v3738_v33  ;;  %v3745_v33 = vld [vmem:[#allocation5_spill] sm:$0xff] }
 0x16d   : > { %v896_v28 = vadd.f32 %v864_v49, %v700_v0  ;;  %v1071_v17 = vadd.f32 %v1039_v31, %v875_v5  ;;  %v876_v49 = vadd.f32 %v844_v36, %v680_v16  ;;  %v846_v0 = vmul.f32 %v2745_v47, %v2891_v52  ;;  %v3744_v5 = vld [vmem:[#allocation22_spill] sm:$0xff] }
 0x16e   : > { %v682_v31 = vadd.f32 %v650_v23, %v486_v3  ;;  %v652_v10 = vmul.f32 %v2738_v2, %v3744_v5 }
 0x16f   : > { %v2972_v55 = vpop.permute.xlu1 %616  ;;  %v3057_v24 = vadd.f32 %v2769_v39, %v1071_v17 }
 0x170   : > { %v878_v36 = vadd.f32 %v846_v0, %v682_v31  ;;  %v3750_v31 = vld [vmem:[#allocation29_spill] sm:$0xff] }
 0x171   : > { %v1151_v48 = vsel %vm1138_vm0, %v3057_v24, 0.0 }
 0x174   : > { %v2976_v32 = vpop.permute.xlu1 %936 }
 0x179   : > { %v2986_v12 = vpop.permute.xlu1 %556 }
 0x17d   : > { %v621_v9 = vpop.permute.xlu1 %620 }
 0x17e   : > { %v670_v13 = vmul.f32 %v2738_v2, %v621_v9  ;;  %v1040_v9 = vmul.f32 %v2751_v34, %v2909_v51 }
 0x180   : > { %v702_v46 = vadd.f32 %v670_v13, %v506_v44  ;;  %v3739_v44 = vld [vmem:[#allocation20_spill] sm:$0xff]  ;;  %v1072_v15 = vadd.f32 %v1040_v9, %v876_v49 }
 0x181   : > { %v649_v58 = vmul.f32 %v2738_v2, %v3739_v44 }
 0x182   : > { %v1005_v59 = vpop.permute.xlu1 %1004  ;;  %v3025_v20 = vadd.f32 %v866_v26, %v702_v46  ;;  %v1041_v26 = vmul.f32 %v2751_v34, %v2920_v54  ;;  %v1148_v46 = vsel %vm1138_vm0, %v3041_v27, 0.0  ;;  %v651_v54 = vmul.f32 %v2738_v2, %v2907_v30 }
 0x183   : > { %v1060_v37 = vmul.f32 %v2751_v34, %v1005_v59  ;;  %1188 = vadd.xlane.f32.xlu1 %v1187_v21  ;;  %v681_v25 = vadd.f32 %v649_v58, %v485_v6  ;;  %v1042_v59 = vmul.f32 %v2751_v34, %v2928_v18  ;;  %v847_v30 = vmul.f32 %v2745_v47, %v2954_v42 }
 0x184   : > { %v488_v18 = vmul.f32 %v2736_v22, %v3745_v33  ;;  %v848_v58 = vmul.f32 %v2745_v47, %v2964_v29  ;;  %v669_v29 = vmul.f32 %v2738_v2, %v2972_v55 }
 0x185   : > { %v1092_v61 = vadd.f32 %v1060_v37, %v896_v28  ;;  %v877_v57 = vadd.f32 %v845_v1, %v681_v25  ;;  %v3070_v28 = vadd.f32 %v2769_v39, %v1072_v15  ;;  %v3743_v37 = vld [vmem:[#allocation6_spill] sm:$0xff]  ;;  %v1074_v44 = vadd.f32 %v1042_v59, %v878_v36  ;;  %v3746_v1 = vld [vmem:[#allocation8_spill] sm:$0xff]  ;;  %v3747_v25 = vld [vmem:[#allocation23_spill] sm:$0xff] }
 0x186   : > { %v487_v52 = vmul.f32 %v2736_v22, %v3743_v37  ;;  %v684_v42 = vadd.f32 %v652_v10, %v488_v18  ;;  %v489_v49 = vmul.f32 %v2736_v22, %v3746_v1  ;;  %v653_v35 = vmul.f32 %v2738_v2, %v3747_v25 }
 0x187   : > { %v813_v41 = vpop.permute.xlu1 %812  ;;  %1146 = vadd.xlane.f32.xlu1 %v1145_v38  ;;  %v3044_v13 = vadd.f32 %v2769_v39, %v1092_v61  ;;  %v1073_v11 = vadd.f32 %v1041_v26, %v877_v57  ;;  %v1043_v61 = vmul.f32 %v2751_v34, %v2976_v32  ;;  %v1154_v17 = vsel %vm1138_vm0, %v3070_v28, 0.0  ;;  %v941_v38 = vpop.permute.xlu0 %940  ;;  %v3749_v57 = vld [vmem:[#allocation7_spill] sm:$0xff] }
 0x188   : > { %v683_v16 = vadd.f32 %v651_v54, %v487_v52  ;;  %v1044_v32 = vmul.f32 %v2751_v34, %v941_v38  ;;  %v880_v23 = vadd.f32 %v848_v58, %v684_v42  ;;  %v3099_v26 = vadd.f32 %v2769_v39, %v1074_v44 }
 0x189   : > { %v1214_v51 = vsel %vm1138_vm0, %v3044_v13, 0.0  ;;  %v3089_v9 = vadd.f32 %v2769_v39, %v1073_v11  ;;  %v865_v3 = vmul.f32 %v2745_v47, %v813_v41  ;;  %v490_v55 = vmul.f32 %v2736_v22, %v3749_v57 }
 0x18a   : > { %1215 = vadd.xlane.f32.xlu0 %v1214_v51  ;;  %v879_v63 = vadd.f32 %v847_v30, %v683_v16  ;;  %v849_v54 = vmul.f32 %v2745_v47, %v3750_v31  ;;  %v654_v11 = vmul.f32 %v2738_v2, %v2986_v12  ;;  %v1160_v41 = vsel %vm1138_vm0, %v3099_v26, 0.0 }
 0x18b   : > { %v753_v21 = vpop.permute.xlu1 %752  ;;  %1149 = vadd.xlane.f32.xlu1 %v1148_v46  ;;  %v3748_v46 = vld [vmem:[#allocation14_spill] sm:$0xff]  ;;  %v1157_v0 = vsel %vm1138_vm0, %v3089_v9, 0.0  ;;  %v949_v37 = vpop.permute.xlu0 %948  ;;  %v1076_v10 = vadd.f32 %v1044_v32, %v880_v23 }
 0x18c   : > { %v1075_v51 = vadd.f32 %v1043_v61, %v879_v63  ;;  %v505_v8 = vmul.f32 %v2736_v22, %v3748_v46  ;;  %v850_v30 = vmul.f32 %v2745_v47, %v753_v21  ;;  %v686_v12 = vadd.f32 %v654_v11, %v490_v55  ;;  %v3751_v11 = vld [vmem:[#allocation24_spill] sm:$0xff] }
 0x18d   : > { %v1046_v58 = vmul.f32 %v2751_v34, %v949_v37  ;;  %v3122_v61 = vadd.f32 %v2769_v39, %v1076_v10  ;;  %v3752_v37 = vld [vmem:[#allocation9_spill] sm:$0xff] }
 0x18e   : > { %v701_v59 = vadd.f32 %v669_v29, %v505_v8  ;;  %v3115_v5 = vadd.f32 %v2769_v39, %v1075_v51 }
 0x18f   : > { %1152 = vadd.xlane.f32.xlu1 %v1151_v48  ;;  %v685_v48 = vadd.f32 %v653_v35, %v489_v49  ;;  %v1017_v1 = vpop.permute.xlu0 %1016  ;;  %v1166_v35 = vsel %vm1138_vm0, %v3122_v61, 0.0 }
 0x190   : > { %v3080_v6 = vpop.permute.xlu1 %560  ;;  %v897_v36 = vadd.f32 %v865_v3, %v701_v59  ;;  %v1163_v63 = vsel %vm1138_vm0, %v3115_v5, 0.0  ;;  %v1063_v25 = vmul.f32 %v2751_v34, %v1017_v1 }
 0x191   : > { %v881_v16 = vadd.f32 %v849_v54, %v685_v48  ;;  %v656_v48 = vmul.f32 %v2738_v2, %v3751_v11  ;;  %v870_v11 = vmul.f32 %v2745_v47, %v2845_v60 }
 0x193   : > { %1155 = vadd.xlane.f32.xlu1 %v1154_v17  ;;  %v882_v17 = vadd.f32 %v850_v30, %v686_v12  ;;  %v3753_v30 = vld [vmem:[#allocation10_spill] sm:$0xff] }
 0x195   : > { %v945_v15 = vpop.permute.xlu1 %944  ;;  %v1078_v32 = vadd.f32 %v1046_v58, %v882_v17  ;;  %v957_v58 = vpop.permute.xlu0 %956 }
 0x196   : > { %v1045_v33 = vmul.f32 %v2751_v34, %v945_v15  ;;  %v1095_v15 = vadd.f32 %v1063_v25, %v2832_v7 }
 0x197   : > { %1158 = vadd.xlane.f32.xlu1 %v1157_v0  ;;  %v3143_v3 = vadd.f32 %v2769_v39, %v1078_v32 }
 0x198   : > { %v1077_v42 = vadd.f32 %v1045_v33, %v881_v16  ;;  %v3153_v7 = vadd.f32 %v2769_v39, %v1095_v15  ;;  %v491_v33 = vmul.f32 %v2736_v22, %v3753_v30 }
 0x199   : > { %v1009_v52 = vpop.permute.xlu1 %1008  ;;  %v1172_v31 = vsel %vm1138_vm0, %v3143_v3, 0.0 }
 0x19a   : > { %v1061_v18 = vmul.f32 %v2751_v34, %v1009_v52  ;;  %v3135_v29 = vadd.f32 %v2769_v39, %v1077_v42  ;;  %v1223_v54 = vsel %vm1138_vm0, %v3153_v7, 0.0  ;;  %v492_v52 = vmul.f32 %v2736_v22, %v3752_v37 }
 0x19b   : > { %1161 = vadd.xlane.f32.xlu1 %v1160_v41  ;;  %v655_v41 = vmul.f32 %v2738_v2, %v3080_v6  ;;  %v1048_v42 = vmul.f32 %v2751_v34, %v957_v58 }
 0x19c   : > { %v1093_v44 = vadd.f32 %v1061_v18, %v897_v36  ;;  %v1169_v8 = vsel %vm1138_vm0, %v3135_v29, 0.0  ;;  %v688_v18 = vadd.f32 %v656_v48, %v492_v52 }
 0x19d   : > { %v687_v12 = vadd.f32 %v655_v41, %v491_v33 }
 0x19e   : > { %v629_v38 = vpop.permute.xlu1 %628  ;;  %v3127_v21 = vadd.f32 %v2769_v39, %v1093_v44 }
 0x19f   : > { %1164 = vadd.xlane.f32.xlu1 %v1163_v63 }
 0x1a0   : > { %v1217_v49 = vsel %vm1138_vm0, %v3127_v21, 0.0 }
 0x1a1   : > { %1218 = vadd.xlane.f32.xlu0 %v1217_v49 }
 0x1a3   : > { %v1013_v23 = vpop.permute.xlu1 %1012  ;;  %1167 = vadd.xlane.f32.xlu1 %v1166_v35 }
 0x1a4   : > { %v1062_v51 = vmul.f32 %v2751_v34, %v1013_v23 }
 0x1a6   : > { %v1094_v46 = vadd.f32 %v1062_v51, %v3025_v20  ;;  %v672_v51 = vmul.f32 %v2738_v2, %v629_v38 }
 0x1a7   : > { %1170 = vadd.xlane.f32.xlu1 %v1169_v8 }
 0x1a8   : > { %v757_v0 = vpop.permute.xlu1 %756  ;;  %v3146_v57 = vadd.f32 %v2769_v39, %v1094_v46  ;;  %v3754_v46 = vld [vmem:[#allocation16_spill] sm:$0xff] }
 0x1a9   : > { %v851_v16 = vmul.f32 %v2745_v47, %v757_v0  ;;  %v510_v8 = vmul.f32 %v2736_v22, %v3754_v46  ;;  %v3757_v46 = vld [vmem:[#allocation11_spill] sm:$0xff] }
 0x1aa   : > { %v1220_v55 = vsel %vm1138_vm0, %v3146_v57, 0.0 }
 0x1ab   : > { %1221 = vadd.xlane.f32.xlu0 %v1220_v55  ;;  %1173 = vadd.xlane.f32.xlu1 %v1172_v31  ;;  %v883_v63 = vadd.f32 %v851_v16, %v687_v12  ;;  %v3755_v55 = vld [vmem:[#allocation15_spill] sm:$0xff] }
 0x1ac   : > { %v761_v20 = vpop.permute.xlu1 %760  ;;  %v508_v31 = vmul.f32 %v2736_v22, %v3755_v55 }
 0x1ad   : > { %v852_v10 = vmul.f32 %v2745_v47, %v761_v20 }
 0x1ae   : > { %v704_v38 = vadd.f32 %v672_v51, %v508_v31 }
 0x1af   : > { %1224 = vadd.xlane.f32.xlu0 %v1223_v54  ;;  %v884_v44 = vadd.f32 %v852_v10, %v688_v18  ;;  %v3756_v18 = vld [vmem:[#allocation17_spill] sm:$0xff] }
 0x1b0   : > { %v825_v59 = vpop.permute.xlu1 %824 }
 0x1b1   : > { %v1080_v49 = vadd.f32 %v1048_v42, %v884_v44  ;;  %v868_v20 = vmul.f32 %v2745_v47, %v825_v59  ;;  %v509_v59 = vmul.f32 %v2736_v22, %v3756_v18  ;;  %v1025_v44 = vpop.permute.xlu0 %1024 }
 0x1b2   : > { %v1065_v42 = vmul.f32 %v2751_v34, %v1025_v44 }
 0x1b3   : > { %v3175_v23 = vadd.f32 %v2769_v39, %v1080_v49  ;;  %v900_v41 = vadd.f32 %v868_v20, %v704_v38 }
 0x1b5   : > { %v633_v36 = vpop.permute.xlu1 %632  ;;  %v1178_v54 = vsel %vm1138_vm0, %v3175_v23, 0.0  ;;  %v1141_v49 = vpop.xlane.xlu0 %1140 }
 0x1b6   : > { %v673_v30 = vmul.f32 %v2738_v2, %v633_v36  ;;  %v1236_v31 = vmul.f32 0.03125, %v1141_v49  ;;  %v1668_v49 = vld [vmem:[%s3685_s5 + $0x10] sm:$0xff] }
 0x1b8   : > { %v705_v60 = vadd.f32 %v673_v30, %v509_v59 }
 0x1ba   : > { %v953_v17 = vpop.permute.xlu1 %952 }
 0x1bb   : > { %v1047_v1 = vmul.f32 %v2751_v34, %v953_v17 }
 0x1bd   : > { %v1079_v6 = vadd.f32 %v1047_v1, %v883_v63 }
 0x1bf   : > { %v573_v25 = vpop.permute.xlu1 %572  ;;  %v3170_v35 = vadd.f32 %v2769_v39, %v1079_v6 }
 0x1c1   : > { %v1175_v32 = vsel %vm1138_vm0, %v3170_v35, 0.0 }
 0x1c2   : > { %1176 = vadd.xlane.f32.xlu1 %v1175_v32  ;;  %v658_v32 = vmul.f32 %v2738_v2, %v573_v25 }
 0x1c3   : > { %v637_v15 = vpop.permute.xlu1 %636 }
 0x1c4   : > { %v674_v0 = vmul.f32 %v2738_v2, %v637_v15 }
 0x1c6   : > { %v706_v48 = vadd.f32 %v674_v0, %v510_v8  ;;  %1179 = vadd.xlane.f32.xlu1 %v1178_v54  ;;  %v494_v8 = vmul.f32 %v2736_v22, %v3757_v46  ;;  %v3758_v54 = vld [vmem:[#allocation32_spill] sm:$0xff] }
 0x1c8   : > { %v1021_v37 = vpop.permute.xlu1 %1020  ;;  %v902_v52 = vadd.f32 %v870_v11, %v706_v48  ;;  %v690_v20 = vadd.f32 %v658_v32, %v494_v8  ;;  %v1144_v48 = vpop.xlane.xlu0 %1143 }
 0x1c9   : > { %v1064_v10 = vmul.f32 %v2751_v34, %v1021_v37  ;;  %v1237_v22 = vmul.f32 0.03125, %v1144_v48 }
 0x1cb   : > { %v1096_v33 = vadd.f32 %v1064_v10, %v900_v41  ;;  %v3759_v41 = vld [vmem:[#allocation25_spill] sm:$0xff] }
 0x1cc   : > { %v3215_v10 = vsub.f32 %v3759_v41, %v1236_v31 }
 0x1cd   : > { %v829_v16 = vpop.permute.xlu1 %828  ;;  %v3193_v12 = vadd.f32 %v2769_v39, %v1096_v33 }
 0x1ce   : > { %v869_v58 = vmul.f32 %v2745_v47, %v829_v16  ;;  %v3760_v16 = vld [vmem:[#allocation26_spill] sm:$0xff] }
 0x1cf   : > { %v1226_v17 = vsel %vm1138_vm0, %v3193_v12, 0.0  ;;  %v3224_v44 = vsub.f32 %v3760_v16, %v1237_v22  ;;  %v1192_v46 = vpop.xlane.xlu0 %1191 }
 0x1d0   : > { %v901_v63 = vadd.f32 %v869_v58, %v705_v60  ;;  %1227 = vadd.xlane.f32.xlu0 %v1226_v17  ;;  %v1300_v17 = vmul.f32 %v3215_v10, %v3215_v10 }
 0x1d1   : > { %v769_v36 = vpop.permute.xlu1 %768 }
 0x1d2   : > { %v1097_v1 = vadd.f32 %v1065_v42, %v901_v63  ;;  %v854_v0 = vmul.f32 %v2745_v47, %v769_v36  ;;  %v1332_v63 = vsel %vm1138_vm0, %v1300_v17, 0.0  ;;  %v1301_v36 = vmul.f32 %v3224_v44, %v3224_v44 }
 0x1d3   : > { %v1195_v8 = vpop.xlane.xlu0 %1194 }
 0x1d4   : > { %v3200_v6 = vadd.f32 %v2769_v39, %v1097_v1  ;;  %v886_v37 = vadd.f32 %v854_v0, %v690_v20  ;;  %v1666_v1 = vld [vmem:[%s3685_s5] sm:$0xff] }
 0x1d6   : > { %v961_v51 = vpop.permute.xlu1 %960  ;;  %v1229_v15 = vsel %vm1138_vm0, %v3200_v6, 0.0 }
 0x1d7   : > { %v1049_v55 = vmul.f32 %v2751_v34, %v961_v51  ;;  %1230 = vadd.xlane.f32.xlu0 %v1229_v15  ;;  %v1669_v51 = vld [vmem:[%s3685_s5 + $0x18] sm:$0xff]  ;;  %v1198_v0 = vpop.xlane.xlu0 %1197 }
 0x1d8   : > { %v2230_v15 = vpack.c.bf16 %v1669_v51, %v1668_v49  ;;  %v1255_v22 = vmul.f32 0.03125, %v1198_v0 }
 0x1d9   : > { %v1081_v11 = vadd.f32 %v1049_v55, %v3758_v54  ;;  %v1253_v55 = vmul.f32 0.03125, %v1192_v46 }
 0x1da   : > { %v965_v38 = vpop.permute.xlu1 %964 }
 0x1db   : > { %v1050_v2 = vmul.f32 %v2751_v34, %v965_v38  ;;  %v3212_v25 = vadd.f32 %v2769_v39, %v1081_v11  ;;  %v3252_v54 = vsub.f32 %v2874_v14, %v1253_v55  ;;  %v1254_v11 = vmul.f32 0.03125, %v1195_v8  ;;  %v1201_v48 = vpop.xlane.xlu0 %1200 }
 0x1dd   : > { %v1082_v47 = vadd.f32 %v1050_v2, %v886_v37  ;;  %v1181_v30 = vsel %vm1138_vm0, %v3212_v25, 0.0 }
 0x1de   : > { %v1029_v33 = vpop.permute.xlu1 %1028  ;;  %1182 = vadd.xlane.f32.xlu1 %v1181_v30  ;;  %v3262_v30 = vsub.f32 %v2883_v45, %v1254_v11 }
 0x1df   : > { %v1066_v18 = vmul.f32 %v2751_v34, %v1029_v33  ;;  %v3221_v59 = vadd.f32 %v2769_v39, %v1082_v47  ;;  %v1317_v47 = vmul.f32 %v3252_v54, %v3252_v54 }
 0x1e1   : > { %v1098_v60 = vadd.f32 %v1066_v18, %v902_v52  ;;  %v1184_v58 = vsel %vm1138_vm0, %v3221_v59, 0.0  ;;  %v1335_v52 = vsel %vm1138_vm0, %v1301_v36, 0.0  ;;  %v1383_v17 = vsel %vm1138_vm0, %v1317_v47, 0.0 }
 0x1e2   : > { %1185 = vadd.xlane.f32.xlu1 %v1184_v58  ;;  %v3271_v58 = vsub.f32 %v2896_v50, %v1255_v22 }
 0x1e3   : > { %v3231_v42 = vadd.f32 %v2769_v39, %v1098_v60  ;;  %v1667_v39 = vld [vmem:[%s3685_s5 + $0x8] sm:$0xff] }
 0x1e4   : > { %v2226_v32 = vpack.c.bf16 %v1667_v39, %v1666_v1  ;;  %v1319_v49 = vmul.f32 %v3271_v58, %v3271_v58 }
 0x1e5   : > { %v1232_v34 = vsel %vm1138_vm0, %v3231_v42, 0.0 }
 0x1e6   : > { %1233 = vadd.xlane.f32.xlu0 %v1232_v34  ;;  %1333 = vadd.xlane.f32.xlu1 %v1332_v63  ;;  %v1256_v34 = vmul.f32 0.03125, %v1201_v48  ;;  %v1318_v63 = vmul.f32 %v3262_v30, %v3262_v30 }
 0x1e7   : > { %2227 = vmatprep.subr.bf16.mxu0 %v2226_v32  ;;  %2234 = vmatprep.subr.bf16.mxu1 %v2226_v32 }
 0x1e8   : > { %2229 = vmatpush3.bf16.msra.mxu0 %v2226_v32  ;;  %2236 = vmatpush3.bf16.msra.mxu1 %v2226_v32 }
 0x1e9   : > { %2231 = vmatprep.subr.bf16.mxu0 %v2230_v15  ;;  %2235 = vmatprep.subr.bf16.mxu1 %v2230_v15 }
 0x1ea   : > { %1336 = vadd.xlane.f32.xlu1 %v1335_v52 }
 0x1ec   : > { %2233 = vmatpush3.bf16.msra.mxu0 %v2230_v15  ;;  %2237 = vmatpush3.bf16.msra.mxu1 %v2230_v15  ;;  %v1386_v15 = vsel %vm1138_vm0, %v1318_v63, 0.0 }
 0x210   : > { %v1189_v31 = vpop.xlane.xlu1 %1188 }
 0x211   : > { %v1252_v20 = vmul.f32 0.03125, %v1189_v31 }
 0x213   : > { %v3255_v38 = vsub.f32 %v3004_v62, %v1252_v20  ;;  %v1204_v62 = vpop.xlane.xlu0 %1203 }
 0x214   : > { %v1147_v37 = vpop.xlane.xlu1 %1146  ;;  %v1257_v39 = vmul.f32 0.03125, %v1204_v62 }
 0x215   : > { %v1238_v2 = vmul.f32 0.03125, %v1147_v37  ;;  %v1316_v41 = vmul.f32 %v3255_v38, %v3255_v38 }
 0x216   : > { %v3295_v31 = vsub.f32 %v2915_v19, %v1257_v39 }
 0x217   : > { %v3265_v14 = vsub.f32 %v3023_v53, %v1238_v2  ;;  %v1380_v33 = vsel %vm1138_vm0, %v1316_v41, 0.0  ;;  %v1207_v52 = vpop.xlane.xlu0 %1206 }
 0x218   : > { %v1150_v18 = vpop.xlane.xlu1 %1149  ;;  %1381 = vadd.xlane.f32.xlu0 %v1380_v33  ;;  %v1258_v20 = vmul.f32 0.03125, %v1207_v52  ;;  %v1321_v22 = vmul.f32 %v3295_v31, %v3295_v31 }
 0x219   : > { %v1239_v16 = vmul.f32 0.03125, %v1150_v18  ;;  %v1302_v60 = vmul.f32 %v3265_v14, %v3265_v14 }
 0x21a   : > { %v3309_v47 = vsub.f32 %v2942_v56, %v1258_v20  ;;  %v1395_v56 = vsel %vm1138_vm0, %v1321_v22, 0.0 }
 0x21b   : > { %v3275_v45 = vsub.f32 %v3041_v27, %v1239_v16  ;;  %v1338_v53 = vsel %vm1138_vm0, %v1302_v60, 0.0  ;;  %v3285_v27 = vsub.f32 %v2905_v43, %v1256_v34  ;;  %v1210_v8 = vpop.xlane.xlu0 %1209  ;;  %v1389_v43 = vsel %vm1138_vm0, %v1319_v49, 0.0 }
 0x21c   : > { %v1153_v36 = vpop.xlane.xlu1 %1152  ;;  %1339 = vadd.xlane.f32.xlu1 %v1338_v53  ;;  %1384 = vadd.xlane.f32.xlu0 %v1383_v17  ;;  %v1259_v19 = vmul.f32 0.03125, %v1210_v8  ;;  %v1322_v52 = vmul.f32 %v3309_v47, %v3309_v47 }
 0x21d   : > { %v1240_v1 = vmul.f32 0.03125, %v1153_v36  ;;  %v1303_v50 = vmul.f32 %v3275_v45, %v3275_v45  ;;  %v1320_v48 = vmul.f32 %v3285_v27, %v3285_v27 }
 0x21e   : > { %v3319_v34 = vsub.f32 %v2957_v40, %v1259_v19 }
 0x21f   : > { %v3288_v32 = vsub.f32 %v3057_v24, %v1240_v1  ;;  %v1341_v51 = vsel %vm1138_vm0, %v1303_v50, 0.0  ;;  %v1392_v62 = vsel %vm1138_vm0, %v1320_v48, 0.0 }
 0x220   : > { %v1156_v46 = vpop.xlane.xlu1 %1155  ;;  %1342 = vadd.xlane.f32.xlu1 %v1341_v51  ;;  %1387 = vadd.xlane.f32.xlu0 %v1386_v15  ;;  %v1323_v49 = vmul.f32 %v3319_v34, %v3319_v34 }
 0x221   : > { %v1241_v0 = vmul.f32 0.03125, %v1156_v46  ;;  %v1304_v55 = vmul.f32 %v3288_v32, %v3288_v32  ;;  %v1398_v46 = vsel %vm1138_vm0, %v1322_v52, 0.0 }
 0x223   : > { %v3299_v24 = vsub.f32 %v3070_v28, %v1241_v0  ;;  %v1344_v11 = vsel %vm1138_vm0, %v1304_v55, 0.0  ;;  %v1213_v28 = vpop.xlane.xlu0 %1212 }
 0x224   : > { %v1159_v37 = vpop.xlane.xlu1 %1158  ;;  %1345 = vadd.xlane.f32.xlu1 %v1344_v11  ;;  %1390 = vadd.xlane.f32.xlu0 %v1389_v43  ;;  %v1260_v53 = vmul.f32 0.03125, %v1213_v28 }
 0x225   : > { %v1242_v2 = vmul.f32 0.03125, %v1159_v37  ;;  %v1305_v41 = vmul.f32 %v3299_v24, %v3299_v24 }
 0x226   : > { %v3333_v51 = vsub.f32 %v2962_v4, %v1260_v53  ;;  %v1401_v4 = vsel %vm1138_vm0, %v1323_v49, 0.0 }
 0x227   : > { %v3312_v33 = vsub.f32 %v3089_v9, %v1242_v2  ;;  %v1347_v18 = vsel %vm1138_vm0, %v1305_v41, 0.0  ;;  %v1216_v63 = vpop.xlane.xlu0 %1215 }
 0x228   : > { %v1162_v16 = vpop.xlane.xlu1 %1161  ;;  %1348 = vadd.xlane.f32.xlu1 %v1347_v18  ;;  %1393 = vadd.xlane.f32.xlu0 %v1392_v62  ;;  %v1261_v39 = vmul.f32 0.03125, %v1216_v63  ;;  %v1324_v37 = vmul.f32 %v3333_v51, %v3333_v51 }
 0x229   : > { %v1243_v60 = vmul.f32 0.03125, %v1162_v16  ;;  %v1306_v17 = vmul.f32 %v3312_v33, %v3312_v33 }
 0x22a   : > { %v3343_v20 = vsub.f32 %v3044_v13, %v1261_v39  ;;  %v1404_v18 = vsel %vm1138_vm0, %v1324_v37, 0.0 }
 0x22b   : > { %v3323_v9 = vsub.f32 %v3099_v26, %v1243_v60  ;;  %v1350_v36 = vsel %vm1138_vm0, %v1306_v17, 0.0 }
 0x22c   : > { %v1165_v1 = vpop.xlane.xlu1 %1164  ;;  %1351 = vadd.xlane.f32.xlu1 %v1350_v36  ;;  %1396 = vadd.xlane.f32.xlu0 %v1395_v56  ;;  %v1325_v13 = vmul.f32 %v3343_v20, %v3343_v20 }
 0x22d   : > { %v1244_v50 = vmul.f32 0.03125, %v1165_v1  ;;  %v1307_v40 = vmul.f32 %v3323_v9, %v3323_v9 }
 0x22e   : > { %v1219_v8 = vpop.xlane.xlu0 %1218  ;;  %v1407_v53 = vsel %vm1138_vm0, %v1325_v13, 0.0 }
 0x22f   : > { %v3336_v26 = vsub.f32 %v3115_v5, %v1244_v50  ;;  %v1353_v15 = vsel %vm1138_vm0, %v1307_v40, 0.0  ;;  %v1262_v11 = vmul.f32 0.03125, %v1219_v8 }
 0x230   : > { %v1168_v0 = vpop.xlane.xlu1 %1167  ;;  %1354 = vadd.xlane.f32.xlu1 %v1353_v15  ;;  %1399 = vadd.xlane.f32.xlu0 %v1398_v46 }
 0x231   : > { %v1245_v55 = vmul.f32 0.03125, %v1168_v0  ;;  %v1308_v43 = vmul.f32 %v3336_v26, %v3336_v26  ;;  %v3357_v22 = vsub.f32 %v3127_v21, %v1262_v11 }
 0x233   : > { %v3347_v5 = vsub.f32 %v3122_v61, %v1245_v55  ;;  %v1356_v48 = vsel %vm1138_vm0, %v1308_v43, 0.0  ;;  %v1326_v36 = vmul.f32 %v3357_v22, %v3357_v22 }
 0x234   : > { %v1171_v2 = vpop.xlane.xlu1 %1170  ;;  %1357 = vadd.xlane.f32.xlu1 %v1356_v48  ;;  %1402 = vadd.xlane.f32.xlu0 %v1401_v4 }
 0x235   : > { %v1246_v41 = vmul.f32 0.03125, %v1171_v2  ;;  %v1309_v19 = vmul.f32 %v3347_v5, %v3347_v5 }
 0x237   : > { %v3360_v61 = vsub.f32 %v3135_v29, %v1246_v41  ;;  %v1359_v28 = vsel %vm1138_vm0, %v1309_v19, 0.0 }
 0x238   : > { %v1174_v62 = vpop.xlane.xlu1 %1173  ;;  %1360 = vadd.xlane.f32.xlu1 %v1359_v28  ;;  %1405 = vadd.xlane.f32.xlu0 %v1404_v18  ;;  %v1222_v16 = vpop.xlane.xlu0 %1221 }
 0x239   : > { %v1247_v60 = vmul.f32 0.03125, %v1174_v62  ;;  %v1263_v17 = vmul.f32 0.03125, %v1222_v16  ;;  %v1310_v56 = vmul.f32 %v3360_v61, %v3360_v61 }
 0x23b   : > { %v3368_v21 = vsub.f32 %v3143_v3, %v1247_v60  ;;  %v3371_v29 = vsub.f32 %v3146_v57, %v1263_v17  ;;  %v1362_v63 = vsel %vm1138_vm0, %v1310_v56, 0.0  ;;  %v1410_v57 = vsel %vm1138_vm0, %v1326_v36, 0.0 }
 0x23c   : > { %1363 = vadd.xlane.f32.xlu1 %v1362_v63  ;;  %1408 = vadd.xlane.f32.xlu0 %v1407_v53  ;;  %v1225_v52 = vpop.xlane.xlu0 %1224 }
 0x23d   : > { %v1264_v1 = vmul.f32 0.03125, %v1225_v52  ;;  %v1311_v50 = vmul.f32 %v3368_v21, %v3368_v21  ;;  %v1327_v39 = vmul.f32 %v3371_v29, %v3371_v29 }
 0x23f   : > { %v3379_v40 = vsub.f32 %v3153_v7, %v1264_v1  ;;  %v1365_v3 = vsel %vm1138_vm0, %v1311_v50, 0.0  ;;  %v1413_v49 = vsel %vm1138_vm0, %v1327_v39, 0.0 }
 0x240   : > { %1366 = vadd.xlane.f32.xlu1 %v1365_v3  ;;  %1411 = vadd.xlane.f32.xlu0 %v1410_v57 }
 0x241   : > { %v1328_v15 = vmul.f32 %v3379_v40, %v3379_v40 }
 0x243   : > { %v1416_v46 = vsel %vm1138_vm0, %v1328_v15, 0.0 }
 0x244   : > { %1414 = vadd.xlane.f32.xlu0 %v1413_v49 }
 0x248   : > { %1417 = vadd.xlane.f32.xlu0 %v1416_v46 }
 0x24f   : > { %v1177_v7 = vpop.xlane.xlu1 %1176 }
 0x250   : > { %v1248_v8 = vmul.f32 0.03125, %v1177_v7 }
 0x252   : > { %v3390_v0 = vsub.f32 %v3170_v35, %v1248_v8 }
 0x253   : > { %v1180_v55 = vpop.xlane.xlu1 %1179 }
 0x254   : > { %v1249_v43 = vmul.f32 0.03125, %v1180_v55  ;;  %v1312_v4 = vmul.f32 %v3390_v0, %v3390_v0 }
 0x256   : > { %v3395_v11 = vsub.f32 %v3175_v23, %v1249_v43  ;;  %v1368_v48 = vsel %vm1138_vm0, %v1312_v4, 0.0 }
 0x257   : > { %1369 = vadd.xlane.f32.xlu1 %v1368_v48  ;;  %v3440_v48 = vld [vmem:[%s3684_s4] ss:$0 sm:$0xff] }
 0x258   : > { %v1313_v37 = vmul.f32 %v3395_v11, %v3395_v11 }
 0x25a   : > { %v1371_v2 = vsel %vm1138_vm0, %v1313_v37, 0.0 }
 0x25b   : > { %1372 = vadd.xlane.f32.xlu1 %v1371_v2 }
 0x25d   : > { %v1228_v41 = vpop.xlane.xlu0 %1227 }
 0x25e   : > { %v1265_v35 = vmul.f32 0.03125, %v1228_v41 }
 0x260   : > { %v3402_v19 = vsub.f32 %v3193_v12, %v1265_v35 }
 0x262   : > { %v1329_v13 = vmul.f32 %v3402_v19, %v3402_v19 }
 0x264   : > { %v1231_v28 = vpop.xlane.xlu0 %1230  ;;  %v1419_v23 = vsel %vm1138_vm0, %v1329_v13, 0.0 }
 0x265   : > { %v1266_v18 = vmul.f32 0.03125, %v1231_v28  ;;  %1420 = vadd.xlane.f32.xlu0 %v1419_v23 }
 0x267   : > { %v3408_v62 = vsub.f32 %v3200_v6, %v1266_v18 }
 0x269   : > { %v1330_v16 = vmul.f32 %v3408_v62, %v3408_v62 }
 0x26b   : > { %v1183_v60 = vpop.xlane.xlu1 %1182  ;;  %v1422_v17 = vsel %vm1138_vm0, %v1330_v16, 0.0 }
 0x26c   : > { %v1250_v56 = vmul.f32 0.03125, %v1183_v60  ;;  %1423 = vadd.xlane.f32.xlu0 %v1422_v17 }
 0x26e   : > { %v3414_v12 = vsub.f32 %v3212_v25, %v1250_v56 }
 0x26f   : > { %v1186_v53 = vpop.xlane.xlu1 %1185 }
 0x270   : > { %v1251_v63 = vmul.f32 0.03125, %v1186_v53  ;;  %v1314_v36 = vmul.f32 %v3414_v12, %v3414_v12 }
 0x272   : > { %v3419_v52 = vsub.f32 %v3221_v59, %v1251_v63  ;;  %v1374_v6 = vsel %vm1138_vm0, %v1314_v36, 0.0 }
 0x273   : > { %v1334_v1 = vpop.xlane.xlu1 %1333  ;;  %1375 = vadd.xlane.f32.xlu1 %v1374_v6  ;;  %v1234_v50 = vpop.xlane.xlu0 %1233 }
 0x274   : > { %v1428_v3 = vmul.f32 0.03125, %v1334_v1  ;;  %v1267_v57 = vmul.f32 0.03125, %v1234_v50  ;;  %v1315_v39 = vmul.f32 %v3419_v52, %v3419_v52 }
 0x276   : > { %v1460_v25 = vadd.f32 1e-05, %v1428_v3  ;;  %v3425_v49 = vsub.f32 %v3231_v42, %v1267_v57  ;;  %v1377_v15 = vsel %vm1138_vm0, %v1315_v39, 0.0  ;;  %v3434_v42 = vld [vmem:[%s3683_s3] ss:$0 sm:$0xff] }
 0x277   : > { %1378 = vadd.xlane.f32.xlu1 %v1377_v15  ;;  %v1337_v46 = vpop.xlane.xlu1 %1336 }
 0x278   : > { %2290 = vrsqrt.f32 %v1460_v25  ;;  %v1429_v59 = vmul.f32 0.03125, %v1337_v46  ;;  %v1331_v7 = vmul.f32 %v3425_v49, %v3425_v49 }
 0x27a   : > { %v1461_v8 = vadd.f32 1e-05, %v1429_v59  ;;  %v1425_v55 = vsel %vm1138_vm0, %v1331_v7, 0.0 }
 0x27b   : > { %1426 = vadd.xlane.f32.xlu0 %v1425_v55 }
 0x27c   : > { %2292 = vrsqrt.f32 %v1461_v8 }
 0x282   : > { %v2291_v43 = vpop.eup %2290 }
 0x283   : > { %v1524_v4 = vmul.f32 %v2291_v43, %v3215_v10 }
 0x285   : > { %v1563_v37 = vmul.f32 %v3434_v42, %v1524_v4 }
 0x286   : > { %v2293_v2 = vpop.eup %2292 }
 0x287   : > { %v1602_v41 = vadd.f32 %v3440_v48, %v1563_v37  ;;  %v1525_v35 = vmul.f32 %v2293_v2, %v3224_v44 }
 0x289   : > { %v1634_v13 = vmax.f32 %v1602_v41, 0.0  ;;  %v1564_v28 = vmul.f32 %v3434_v42, %v1525_v35 }
 0x28b   : > { %2178 = vmatprep.mubr.msk.f32.mxu0 %vm1138_vm0, %v1634_v13  ;;  %v1603_v23 = vadd.f32 %v3440_v48, %v1564_v28 }
 0x28d   : > { %v1635_v10 = vmax.f32 %v1603_v23, 0.0 }
 0x28f   : > { %2179 = vmatmul.mubr.msk.f32.vlgmr.msra.gmra.mrb[0].mxu0 %vm1138_vm0, %v1635_v10 }
 0x2a5   : > { %v1382_v18 = vpop.xlane.xlu0 %1381 }
 0x2a6   : > { %v1444_v16 = vmul.f32 0.03125, %v1382_v18 }
 0x2a8   : > { %v1476_v60 = vadd.f32 1e-05, %v1444_v16 }
 0x2a9   : > { %v1340_v17 = vpop.xlane.xlu1 %1339  ;;  %v1385_v56 = vpop.xlane.xlu0 %1384 }
 0x2aa   : > { %2294 = vrsqrt.f32 %v1476_v60  ;;  %v1430_v53 = vmul.f32 0.03125, %v1340_v17  ;;  %v1445_v63 = vmul.f32 0.03125, %v1385_v56 }
 0x2ac   : > { %v1462_v36 = vadd.f32 1e-05, %v1430_v53  ;;  %v1477_v44 = vadd.f32 1e-05, %v1445_v63 }
 0x2ad   : > { %v1343_v6 = vpop.xlane.xlu1 %1342  ;;  %v1388_v1 = vpop.xlane.xlu0 %1387 }
 0x2ae   : > { %2296 = vrsqrt.f32 %v1462_v36  ;;  %v1431_v50 = vmul.f32 0.03125, %v1343_v6  ;;  %v1446_v3 = vmul.f32 0.03125, %v1388_v1 }
 0x2af   : > { %2298 = vrsqrt.f32 %v1477_v44 }
 0x2b0   : > { %v1463_v57 = vadd.f32 1e-05, %v1431_v50  ;;  %v1478_v39 = vadd.f32 1e-05, %v1446_v3 }
 0x2b1   : > { %v1346_v25 = vpop.xlane.xlu1 %1345  ;;  %v1391_v15 = vpop.xlane.xlu0 %1390 }
 0x2b2   : > { %2300 = vrsqrt.f32 %v1463_v57  ;;  %v1432_v46 = vmul.f32 0.03125, %v1346_v25  ;;  %v1447_v59 = vmul.f32 0.03125, %v1391_v15 }
 0x2b3   : > { %2302 = vrsqrt.f32 %v1478_v39 }
 0x2b4   : > { %v2295_v7 = vpop.eup %2294  ;;  %v1464_v8 = vadd.f32 1e-05, %v1432_v46  ;;  %v1479_v55 = vadd.f32 1e-05, %v1447_v59 }
 0x2b5   : > { %v1349_v43 = vpop.xlane.xlu1 %1348  ;;  %v1394_v4 = vpop.xlane.xlu0 %1393  ;;  %v1540_v37 = vmul.f32 %v2295_v7, %v3255_v38 }
 0x2b6   : > { %2304 = vrsqrt.f32 %v1464_v8  ;;  %v1433_v2 = vmul.f32 0.03125, %v1349_v43  ;;  %v1448_v41 = vmul.f32 0.03125, %v1394_v4 }
 0x2b7   : > { %2306 = vrsqrt.f32 %v1479_v55  ;;  %v1579_v35 = vmul.f32 %v3434_v42, %v1540_v37 }
 0x2b8   : > { %v2297_v13 = vpop.eup %2296  ;;  %v1465_v28 = vadd.f32 1e-05, %v1433_v2  ;;  %v1480_v23 = vadd.f32 1e-05, %v1448_v41 }
 0x2b9   : > { %v2299_v10 = vpop.eup %2298  ;;  %v1352_v18 = vpop.xlane.xlu1 %1351  ;;  %v1618_v60 = vadd.f32 %v3440_v48, %v1579_v35  ;;  %v1526_v17 = vmul.f32 %v2297_v13, %v3265_v14 }
 0x2ba   : > { %v1397_v16 = vpop.xlane.xlu0 %1396  ;;  %2308 = vrsqrt.f32 %v1465_v28  ;;  %v1434_v56 = vmul.f32 0.03125, %v1352_v18  ;;  %v1541_v38 = vmul.f32 %v2299_v10, %v3252_v54 }
 0x2bb   : > { %v1449_v53 = vmul.f32 0.03125, %v1397_v16  ;;  %2310 = vrsqrt.f32 %v1480_v23  ;;  %v1650_v63 = vmax.f32 %v1618_v60, 0.0  ;;  %v1565_v36 = vmul.f32 %v3434_v42, %v1526_v17 }
 0x2bc   : > { %v2301_v44 = vpop.eup %2300  ;;  %v1466_v6 = vadd.f32 1e-05, %v1434_v56  ;;  %v1580_v50 = vmul.f32 %v3434_v42, %v1541_v38 }
 0x2bd   : > { %v1481_v1 = vadd.f32 1e-05, %v1449_v53  ;;  %v2303_v3 = vpop.eup %2302  ;;  %v1355_v57 = vpop.xlane.xlu1 %1354  ;;  %2202 = vmatprep.mubr.msk.f32.mxu1 %vm1138_vm0, %v1650_v63  ;;  %v1604_v14 = vadd.f32 %v3440_v48, %v1565_v36  ;;  %v1527_v25 = vmul.f32 %v2301_v44, %v3275_v45 }
 0x2be   : > { %v1400_v39 = vpop.xlane.xlu0 %1399  ;;  %2312 = vrsqrt.f32 %v1466_v6  ;;  %v1435_v54 = vmul.f32 0.03125, %v1355_v57  ;;  %v1619_v46 = vadd.f32 %v3440_v48, %v1580_v50  ;;  %v1542_v8 = vmul.f32 %v2303_v3, %v3262_v30 }
 0x2bf   : > { %v1450_v15 = vmul.f32 0.03125, %v1400_v39  ;;  %2314 = vrsqrt.f32 %v1481_v1  ;;  %v1636_v59 = vmax.f32 %v1604_v14, 0.0  ;;  %v1566_v7 = vmul.f32 %v3434_v42, %v1527_v25 }
 0x2c0   : > { %v2305_v55 = vpop.eup %2304  ;;  %v1467_v43 = vadd.f32 1e-05, %v1435_v54  ;;  %v1651_v37 = vmax.f32 %v1619_v46, 0.0  ;;  %v1581_v13 = vmul.f32 %v3434_v42, %v1542_v8 }
 0x2c1   : > { %v1482_v4 = vadd.f32 1e-05, %v1450_v15  ;;  %v2307_v2 = vpop.eup %2306  ;;  %2181 = vmatprep.mubr.msk.f32.mxu0 %vm1138_vm0, %v1636_v59  ;;  %v1358_v41 = vpop.xlane.xlu1 %1357  ;;  %v1605_v35 = vadd.f32 %v3440_v48, %v1566_v7  ;;  %v1528_v28 = vmul.f32 %v2305_v55, %v3288_v32 }
 0x2c2   : > { %v1403_v45 = vpop.xlane.xlu0 %1402  ;;  %2316 = vrsqrt.f32 %v1467_v43  ;;  %v1436_v23 = vmul.f32 0.03125, %v1358_v41  ;;  %2203 = vmatmul.mubr.msk.f32.vlgmr.msra.gmra.mrb[0].mxu1 %vm1138_vm0, %v1651_v37  ;;  %v1543_v10 = vmul.f32 %v2307_v2, %v3271_v58  ;;  %v1620_v16 = vadd.f32 %v3440_v48, %v1581_v13 }
 0x2c3   : > { %v1451_v30 = vmul.f32 0.03125, %v1403_v45  ;;  %2318 = vrsqrt.f32 %v1482_v4  ;;  %v1637_v18 = vmax.f32 %v1605_v35, 0.0  ;;  %v1567_v60 = vmul.f32 %v3434_v42, %v1528_v28 }
 0x2c4   : > { %v2309_v17 = vpop.eup %2308  ;;  %v1468_v56 = vadd.f32 1e-05, %v1436_v23  ;;  %v1582_v38 = vmul.f32 %v3434_v42, %v1543_v10  ;;  %v1652_v36 = vmax.f32 %v1620_v16, 0.0 }
 0x2c5   : > { %v1483_v53 = vadd.f32 1e-05, %v1451_v30  ;;  %v2311_v63 = vpop.eup %2310  ;;  %2182 = vmatmul.mubr.msk.f32.gmra.mrb[2].mxu0 %vm1138_vm0, %v1637_v18  ;;  %v1361_v32 = vpop.xlane.xlu1 %1360  ;;  %v1606_v6 = vadd.f32 %v3440_v48, %v1567_v60  ;;  %v1529_v58 = vmul.f32 %v2309_v17, %v3299_v24 }
 0x2c6   : > { %v1406_v44 = vpop.xlane.xlu0 %1405  ;;  %2320 = vrsqrt.f32 %v1468_v56  ;;  %v1437_v1 = vmul.f32 0.03125, %v1361_v32  ;;  %v1621_v3 = vadd.f32 %v3440_v48, %v1582_v38  ;;  %2205 = vmatprep.mubr.msk.f32.mxu1 %vm1138_vm0, %v1652_v36  ;;  %v1544_v14 = vmul.f32 %v2311_v63, %v3285_v27 }
 0x2c7   : > { %v1452_v50 = vmul.f32 0.03125, %v1406_v44  ;;  %2322 = vrsqrt.f32 %v1483_v53  ;;  %v1638_v57 = vmax.f32 %v1606_v6, 0.0  ;;  %v1568_v39 = vmul.f32 %v3434_v42, %v1529_v58 }
 0x2c8   : > { %v2313_v25 = vpop.eup %2312  ;;  %v1469_v54 = vadd.f32 1e-05, %v1437_v1  ;;  %v1653_v46 = vmax.f32 %v1621_v3, 0.0  ;;  %v1583_v55 = vmul.f32 %v3434_v42, %v1544_v14 }
 0x2c9   : > { %v1484_v15 = vadd.f32 1e-05, %v1452_v50  ;;  %v2315_v59 = vpop.eup %2314  ;;  %2184 = vmatprep.mubr.msk.f32.mxu0 %vm1138_vm0, %v1638_v57  ;;  %v1364_v24 = vpop.xlane.xlu1 %1363  ;;  %v1607_v8 = vadd.f32 %v3440_v48, %v1568_v39  ;;  %v1530_v43 = vmul.f32 %v2313_v25, %v3312_v33 }
 0x2ca   : > { %v1409_v7 = vpop.xlane.xlu0 %1408  ;;  %2324 = vrsqrt.f32 %v1469_v54  ;;  %v1438_v4 = vmul.f32 0.03125, %v1364_v24  ;;  %2206 = vmatmul.mubr.msk.f32.gmra.mrb[2].mxu1 %vm1138_vm0, %v1653_v46  ;;  %v1545_v37 = vmul.f32 %v2315_v59, %v3295_v31  ;;  %v1622_v41 = vadd.f32 %v3440_v48, %v1583_v55 }
 0x2cb   : > { %v1453_v27 = vmul.f32 0.03125, %v1409_v7  ;;  %2326 = vrsqrt.f32 %v1484_v15  ;;  %v1639_v2 = vmax.f32 %v1607_v8, 0.0  ;;  %v1569_v45 = vmul.f32 %v3434_v42, %v1530_v43 }
 0x2cc   : > { %v2317_v35 = vpop.eup %2316  ;;  %v1470_v13 = vadd.f32 1e-05, %v1438_v4  ;;  %v1584_v23 = vmul.f32 %v3434_v42, %v1545_v37  ;;  %v1654_v10 = vmax.f32 %v1622_v41, 0.0 }
 0x2cd   : > { %v1485_v28 = vadd.f32 1e-05, %v1453_v27  ;;  %v2319_v30 = vpop.eup %2318  ;;  %2185 = vmatmul.mubr.msk.f32.gmra.mrb[4].mxu0 %vm1138_vm0, %v1639_v2  ;;  %v1367_v33 = vpop.xlane.xlu1 %1366  ;;  %v1608_v16 = vadd.f32 %v3440_v48, %v1569_v45  ;;  %v1531_v31 = vmul.f32 %v2317_v35, %v3323_v9 }
 0x2ce   : > { %v1412_v18 = vpop.xlane.xlu0 %1411  ;;  %2328 = vrsqrt.f32 %v1470_v13  ;;  %v1439_v60 = vmul.f32 0.03125, %v1367_v33  ;;  %v1623_v56 = vadd.f32 %v3440_v48, %v1584_v23  ;;  %2208 = vmatprep.mubr.msk.f32.mxu1 %vm1138_vm0, %v1654_v10  ;;  %v1546_v63 = vmul.f32 %v2319_v30, %v3309_v47 }
 0x2cf   : > { %v1454_v17 = vmul.f32 0.03125, %v1412_v18  ;;  %2330 = vrsqrt.f32 %v1485_v28  ;;  %v1640_v53 = vmax.f32 %v1608_v16, 0.0  ;;  %v1570_v38 = vmul.f32 %v3434_v42, %v1531_v31 }
 0x2d0   : > { %v2321_v32 = vpop.eup %2320  ;;  %v1471_v36 = vadd.f32 1e-05, %v1439_v60  ;;  %v1655_v6 = vmax.f32 %v1623_v56, 0.0  ;;  %v1585_v50 = vmul.f32 %v3434_v42, %v1546_v63 }
 0x2d1   : > { %v1486_v44 = vadd.f32 1e-05, %v1454_v17  ;;  %v2323_v58 = vpop.eup %2322  ;;  %2187 = vmatprep.mubr.msk.f32.mxu0 %vm1138_vm0, %v1640_v53  ;;  %v1609_v1 = vadd.f32 %v3440_v48, %v1570_v38  ;;  %v1532_v3 = vmul.f32 %v2321_v32, %v3336_v26 }
 0x2d2   : > { %v1415_v9 = vpop.xlane.xlu0 %1414  ;;  %2332 = vrsqrt.f32 %v1471_v36  ;;  %2209 = vmatmul.mubr.msk.f32.gmra.mrb[4].mxu1 %vm1138_vm0, %v1655_v6  ;;  %v1547_v47 = vmul.f32 %v2323_v58, %v3319_v34  ;;  %v1624_v14 = vadd.f32 %v3440_v48, %v1585_v50 }
 0x2d3   : > { %v1455_v57 = vmul.f32 0.03125, %v1415_v9  ;;  %2334 = vrsqrt.f32 %v1486_v44  ;;  %v1641_v39 = vmax.f32 %v1609_v1, 0.0  ;;  %v1571_v25 = vmul.f32 %v3434_v42, %v1532_v3 }
 0x2d4   : > { %v2325_v54 = vpop.eup %2324  ;;  %v1586_v46 = vmul.f32 %v3434_v42, %v1547_v47  ;;  %v1656_v26 = vmax.f32 %v1624_v14, 0.0 }
 0x2d5   : > { %v1487_v15 = vadd.f32 1e-05, %v1455_v57  ;;  %v2327_v59 = vpop.eup %2326  ;;  %2188 = vmatmul.mubr.msk.f32.gmra.mrb[6].mxu0 %vm1138_vm0, %v1641_v39  ;;  %v1610_v7 = vadd.f32 %v3440_v48, %v1571_v25  ;;  %v1533_v8 = vmul.f32 %v2325_v54, %v3347_v5 }
 0x2d6   : > { %v1418_v24 = vpop.xlane.xlu0 %1417  ;;  %v1625_v55 = vadd.f32 %v3440_v48, %v1586_v46  ;;  %v1548_v43 = vmul.f32 %v2327_v59, %v3333_v51  ;;  %2211 = vmatprep.mubr.msk.f32.mxu1 %vm1138_vm0, %v1656_v26 }
 0x2d7   : > { %2336 = vrsqrt.f32 %v1487_v15  ;;  %v1456_v34 = vmul.f32 0.03125, %v1418_v24  ;;  %v1642_v4 = vmax.f32 %v1610_v7, 0.0  ;;  %v1572_v27 = vmul.f32 %v3434_v42, %v1533_v8 }
 0x2d8   : > { %v2329_v37 = vpop.eup %2328  ;;  %v1657_v41 = vmax.f32 %v1625_v55, 0.0  ;;  %v1587_v45 = vmul.f32 %v3434_v42, %v1548_v43 }
 0x2d9   : > { %v1488_v2 = vadd.f32 1e-05, %v1456_v34  ;;  %v2331_v35 = vpop.eup %2330  ;;  %2190 = vmatprep.mubr.msk.f32.mxu0 %vm1138_vm0, %v1642_v4  ;;  %v1611_v5 = vadd.f32 %v3440_v48, %v1572_v27  ;;  %v1534_v13 = vmul.f32 %v2329_v37, %v3360_v61 }
 0x2da   : > { %2212 = vmatmul.mubr.msk.f32.gmra.mrb[6].mxu1 %vm1138_vm0, %v1657_v41  ;;  %v1626_v51 = vadd.f32 %v3440_v48, %v1587_v45  ;;  %v1549_v28 = vmul.f32 %v2331_v35, %v3343_v20 }
 0x2db   : > { %2338 = vrsqrt.f32 %v1488_v2  ;;  %v1643_v23 = vmax.f32 %v1611_v5, 0.0  ;;  %v1573_v30 = vmul.f32 %v3434_v42, %v1534_v13 }
 0x2dc   : > { %v2333_v33 = vpop.eup %2332  ;;  %v1658_v10 = vmax.f32 %v1626_v51, 0.0  ;;  %v1588_v18 = vmul.f32 %v3434_v42, %v1549_v28 }
 0x2dd   : > { %v2335_v16 = vpop.eup %2334  ;;  %2191 = vmatmul.mubr.msk.f32.gmra.mrb[8].mxu0 %vm1138_vm0, %v1643_v23  ;;  %v1612_v31 = vadd.f32 %v3440_v48, %v1573_v30  ;;  %v1535_v61 = vmul.f32 %v2333_v33, %v3368_v21 }
 0x2de   : > { %2214 = vmatprep.mubr.msk.f32.mxu1 %vm1138_vm0, %v1658_v10  ;;  %v1627_v60 = vadd.f32 %v3440_v48, %v1588_v18  ;;  %v1550_v20 = vmul.f32 %v2335_v16, %v3357_v22 }
 0x2df   : > { %v1644_v17 = vmax.f32 %v1612_v31, 0.0  ;;  %v1574_v56 = vmul.f32 %v3434_v42, %v1535_v61 }
 0x2e0   : > { %v1659_v38 = vmax.f32 %v1627_v60, 0.0  ;;  %v1589_v63 = vmul.f32 %v3434_v42, %v1550_v20 }
 0x2e1   : > { %v2337_v53 = vpop.eup %2336  ;;  %2193 = vmatprep.mubr.msk.f32.mxu0 %vm1138_vm0, %v1644_v17  ;;  %v1613_v32 = vadd.f32 %v3440_v48, %v1574_v56 }
 0x2e2   : > { %v1551_v36 = vmul.f32 %v2337_v53, %v3371_v29  ;;  %2215 = vmatmul.mubr.msk.f32.gmra.mrb[8].mxu1 %vm1138_vm0, %v1659_v38  ;;  %v1628_v21 = vadd.f32 %v3440_v48, %v1589_v63 }
 0x2e3   : > { %v1645_v44 = vmax.f32 %v1613_v32, 0.0 }
 0x2e4   : > { %v1590_v22 = vmul.f32 %v3434_v42, %v1551_v36  ;;  %v1370_v58 = vpop.xlane.xlu1 %1369  ;;  %v1660_v9 = vmax.f32 %v1628_v21, 0.0 }
 0x2e5   : > { %v2339_v6 = vpop.eup %2338  ;;  %v1440_v1 = vmul.f32 0.03125, %v1370_v58  ;;  %2194 = vmatmul.mubr.msk.f32.gmra.mrb[10].mxu0 %vm1138_vm0, %v1645_v44 }
 0x2e6   : > { %v1629_v50 = vadd.f32 %v3440_v48, %v1590_v22  ;;  %v1552_v3 = vmul.f32 %v2339_v6, %v3379_v40  ;;  %2217 = vmatprep.mubr.msk.f32.mxu1 %vm1138_vm0, %v1660_v9 }
 0x2e7   : > { %v1472_v29 = vadd.f32 1e-05, %v1440_v1  ;;  %v3572_v1 = vld [vmem:[%s3686_s6] ss:$0 sm:$0xff] }
 0x2e8   : > { %v1661_v57 = vmax.f32 %v1629_v50, 0.0  ;;  %v1591_v47 = vmul.f32 %v3434_v42, %v1552_v3  ;;  %v1373_v39 = vpop.xlane.xlu1 %1372 }
 0x2e9   : > { %2340 = vrsqrt.f32 %v1472_v29  ;;  %v1441_v14 = vmul.f32 0.03125, %v1373_v39 }
 0x2ea   : > { %2218 = vmatmul.mubr.msk.f32.gmra.mrb[10].mxu1 %vm1138_vm0, %v1661_v57  ;;  %v1630_v25 = vadd.f32 %v3440_v48, %v1591_v47 }
 0x2eb   : > { %v1473_v54 = vadd.f32 1e-05, %v1441_v14 }
 0x2ec   : > { %v1662_v15 = vmax.f32 %v1630_v25, 0.0 }
 0x2ed   : > { %2342 = vrsqrt.f32 %v1473_v54 }
 0x2ee   : > { %2220 = vmatprep.mubr.msk.f32.mxu1 %vm1138_vm0, %v1662_v15 }
 0x2f2   : > { %v1421_v46 = vpop.xlane.xlu0 %1420 }
 0x2f3   : > { %v2341_v40 = vpop.eup %2340  ;;  %v1457_v59 = vmul.f32 0.03125, %v1421_v46 }
 0x2f4   : > { %v1536_v26 = vmul.f32 %v2341_v40, %v3390_v0 }
 0x2f5   : > { %v1489_v24 = vadd.f32 1e-05, %v1457_v59 }
 0x2f6   : > { %v1575_v7 = vmul.f32 %v3434_v42, %v1536_v26 }
 0x2f7   : > { %v2343_v8 = vpop.eup %2342  ;;  %2344 = vrsqrt.f32 %v1489_v24 }
 0x2f8   : > { %v1614_v34 = vadd.f32 %v3440_v48, %v1575_v7  ;;  %v1537_v55 = vmul.f32 %v2343_v8, %v3395_v11 }
 0x2f9   : > { %v1424_v43 = vpop.xlane.xlu0 %1423 }
 0x2fa   : > { %v1458_v4 = vmul.f32 0.03125, %v1424_v43  ;;  %v1646_v27 = vmax.f32 %v1614_v34, 0.0  ;;  %v1576_v37 = vmul.f32 %v3434_v42, %v1537_v55 }
 0x2fc   : > { %v1490_v2 = vadd.f32 1e-05, %v1458_v4  ;;  %2196 = vmatprep.mubr.msk.f32.mxu0 %vm1138_vm0, %v1646_v27  ;;  %v1615_v41 = vadd.f32 %v3440_v48, %v1576_v37 }
 0x2fe   : > { %2346 = vrsqrt.f32 %v1490_v2  ;;  %v1647_v0 = vmax.f32 %v1615_v41, 0.0 }
 0x300   : > { %2197 = vmatmul.mubr.msk.f32.gmra.mrb[12].mxu0 %vm1138_vm0, %v1647_v0  ;;  %v1376_v45 = vpop.xlane.xlu1 %1375 }
 0x301   : > { %v2345_v35 = vpop.eup %2344  ;;  %v1442_v5 = vmul.f32 0.03125, %v1376_v45 }
 0x302   : > { %v1553_v13 = vmul.f32 %v2345_v35, %v3402_v19 }
 0x303   : > { %v1474_v11 = vadd.f32 1e-05, %v1442_v5 }
 0x304   : > { %v1379_v51 = vpop.xlane.xlu1 %1378  ;;  %v1592_v28 = vmul.f32 %v3434_v42, %v1553_v13 }
 0x305   : > { %2348 = vrsqrt.f32 %v1474_v11  ;;  %v1443_v23 = vmul.f32 0.03125, %v1379_v51 }
 0x306   : > { %v1631_v30 = vadd.f32 %v3440_v48, %v1592_v28 }
 0x307   : > { %v1475_v33 = vadd.f32 1e-05, %v1443_v23 }
 0x308   : > { %v2347_v10 = vpop.eup %2346  ;;  %v1427_v18 = vpop.xlane.xlu0 %1426  ;;  %v1663_v16 = vmax.f32 %v1631_v30, 0.0 }
 0x309   : > { %2350 = vrsqrt.f32 %v1475_v33  ;;  %v1459_v31 = vmul.f32 0.03125, %v1427_v18  ;;  %v1554_v61 = vmul.f32 %v2347_v10, %v3408_v62 }
 0x30a   : > { %2221 = vmatmul.mubr.msk.f32.gmra.mrb[12].mxu1 %vm1138_vm0, %v1663_v16 }
 0x30b   : > { %v1491_v60 = vadd.f32 1e-05, %v1459_v31  ;;  %v1593_v19 = vmul.f32 %v3434_v42, %v1554_v61 }
 0x30d   : > { %2352 = vrsqrt.f32 %v1491_v60  ;;  %v1632_v20 = vadd.f32 %v3440_v48, %v1593_v19 }
 0x30f   : > { %v2349_v17 = vpop.eup %2348  ;;  %v1664_v56 = vmax.f32 %v1632_v20, 0.0 }
 0x310   : > { %v1538_v53 = vmul.f32 %v2349_v17, %v3414_v12 }
 0x311   : > { %2223 = vmatprep.mubr.msk.f32.mxu1 %vm1138_vm0, %v1664_v56 }
 0x312   : > { %v1577_v38 = vmul.f32 %v3434_v42, %v1538_v53 }
 0x313   : > { %v2351_v63 = vpop.eup %2350 }
 0x314   : > { %v1539_v62 = vmul.f32 %v2351_v63, %v3419_v52  ;;  %v1616_v32 = vadd.f32 %v3440_v48, %v1577_v38 }
 0x316   : > { %v1648_v36 = vmax.f32 %v1616_v32, 0.0  ;;  %v1578_v21 = vmul.f32 %v3434_v42, %v1539_v62 }
 0x317   : > { %v2353_v44 = vpop.eup %2352 }
 0x318   : > { %v1555_v22 = vmul.f32 %v2353_v44, %v3425_v49  ;;  %2199 = vmatprep.mubr.msk.f32.mxu0 %vm1138_vm0, %v1648_v36  ;;  %v1617_v12 = vadd.f32 %v3440_v48, %v1578_v21 }
 0x31a   : > { %v1649_v6 = vmax.f32 %v1617_v12, 0.0  ;;  %v1594_v58 = vmul.f32 %v3434_v42, %v1555_v22 }
 0x31c   : > { %2200 = vmatmul.mubr.msk.f32.gmra.mrb[14].mxu0 %vm1138_vm0, %v1649_v6  ;;  %v1633_v9 = vadd.f32 %v3440_v48, %v1594_v58 }
 0x31e   : > { %v1665_v52 = vmax.f32 %v1633_v9, 0.0 }
 0x320   : > { %2224 = vmatmul.mubr.msk.f32.gmra.mrb[14].mxu1 %vm1138_vm0, %v1665_v52 }
 0x362   : > { %v2180_v49 = vpop.f32.mrb[0].mxu0 }
 0x363   : > { %v1845_v42 = vadd.f32 %v2180_v49, %v3572_v1  ;;  %v1839_v48 = vpop.f32.mrb[1].mxu0 }
 0x364   : > { %v1840_v50 = vadd.f32 %v3572_v1, %v1839_v48 }
 0x365   : > { %2000 = vst.msk [vmem:[%s3579_s8 + $0x8] sm:$0xff] %vm1998_vm1, %v1845_v42 }
 0x366   : > { %1999 = vst.msk [vmem:[%s3579_s8] sm:$0xff] %vm1998_vm1, %v1840_v50 }
 0x395   : > { %v2204_v3 = vpop.f32.mrb[0].mxu1 }
 0x396   : > { %v1925_v29 = vadd.f32 %v2204_v3, %v3572_v1  ;;  %v1919_v57 = vpop.f32.mrb[1].mxu1 }
 0x397   : > { %v1920_v47 = vadd.f32 %v3572_v1, %v1919_v57 }
 0x398   : > { %2016 = vst.msk [vmem:[%s3579_s8 + $0x88] sm:$0xff] %vm1998_vm1, %v1925_v29  ;;  %v2183_v39 = vpop.f32.mrb[2].mxu0 }
 0x399   : > { %2015 = vst.msk [vmem:[%s3579_s8 + $0x80] sm:$0xff] %vm1998_vm1, %v1920_v47  ;;  %v1855_v14 = vadd.f32 %v2183_v39, %v3572_v1  ;;  %v1849_v25 = vpop.f32.mrb[3].mxu0 }
 0x39a   : > { %v1850_v54 = vadd.f32 %v3572_v1, %v1849_v25 }
 0x39b   : > { %2002 = vst.msk [vmem:[%s3579_s8 + $0x18] sm:$0xff] %vm1998_vm1, %v1855_v14 }
 0x39c   : > { %2001 = vst.msk [vmem:[%s3579_s8 + $0x10] sm:$0xff] %vm1998_vm1, %v1850_v54 }
 0x39d   : > { %v2207_v15 = vpop.f32.mrb[2].mxu1 }
 0x39e   : > { %v1935_v46 = vadd.f32 %v2207_v15, %v3572_v1  ;;  %v1929_v40 = vpop.f32.mrb[3].mxu1 }
 0x39f   : > { %v1930_v59 = vadd.f32 %v3572_v1, %v1929_v40 }
 0x3a0   : > { %2018 = vst.msk [vmem:[%s3579_s8 + $0x98] sm:$0xff] %vm1998_vm1, %v1935_v46  ;;  %v2186_v26 = vpop.f32.mrb[4].mxu0 }
 0x3a1   : > { %2017 = vst.msk [vmem:[%s3579_s8 + $0x90] sm:$0xff] %vm1998_vm1, %v1930_v59  ;;  %v1865_v24 = vadd.f32 %v2186_v26, %v3572_v1  ;;  %v1859_v7 = vpop.f32.mrb[5].mxu0 }
 0x3a2   : > { %v1860_v8 = vadd.f32 %v3572_v1, %v1859_v7 }
 0x3a3   : > { %2004 = vst.msk [vmem:[%s3579_s8 + $0x28] sm:$0xff] %vm1998_vm1, %v1865_v24 }
 0x3a4   : > { %2003 = vst.msk [vmem:[%s3579_s8 + $0x20] sm:$0xff] %vm1998_vm1, %v1860_v8 }
 0x3a5   : > { %v2210_v34 = vpop.f32.mrb[4].mxu1 }
 0x3a6   : > { %v1945_v55 = vadd.f32 %v2210_v34, %v3572_v1  ;;  %v1939_v43 = vpop.f32.mrb[5].mxu1 }
 0x3a7   : > { %v1940_v4 = vadd.f32 %v3572_v1, %v1939_v43 }
 0x3a8   : > { %2020 = vst.msk [vmem:[%s3579_s8 + $0xa8] sm:$0xff] %vm1998_vm1, %v1945_v55  ;;  %v2189_v27 = vpop.f32.mrb[6].mxu0 }
 0x3a9   : > { %2019 = vst.msk [vmem:[%s3579_s8 + $0xa0] sm:$0xff] %vm1998_vm1, %v1940_v4  ;;  %v1875_v37 = vadd.f32 %v2189_v27, %v3572_v1  ;;  %v1869_v2 = vpop.f32.mrb[7].mxu0 }
 0x3aa   : > { %v1870_v41 = vadd.f32 %v3572_v1, %v1869_v2 }
 0x3ab   : > { %2006 = vst.msk [vmem:[%s3579_s8 + $0x38] sm:$0xff] %vm1998_vm1, %v1875_v37 }
 0x3ac   : > { %2005 = vst.msk [vmem:[%s3579_s8 + $0x30] sm:$0xff] %vm1998_vm1, %v1870_v41 }
 0x3ad   : > { %v2213_v0 = vpop.f32.mrb[6].mxu1 }
 0x3ae   : > { %v1955_v45 = vadd.f32 %v2213_v0, %v3572_v1  ;;  %v1949_v35 = vpop.f32.mrb[7].mxu1 }
 0x3af   : > { %v1950_v5 = vadd.f32 %v3572_v1, %v1949_v35 }
 0x3b0   : > { %2022 = vst.msk [vmem:[%s3579_s8 + $0xb8] sm:$0xff] %vm1998_vm1, %v1955_v45  ;;  %v2192_v13 = vpop.f32.mrb[8].mxu0 }
 0x3b1   : > { %2021 = vst.msk [vmem:[%s3579_s8 + $0xb0] sm:$0xff] %vm1998_vm1, %v1950_v5  ;;  %v1885_v11 = vadd.f32 %v2192_v13, %v3572_v1  ;;  %v1879_v51 = vpop.f32.mrb[9].mxu0 }
 0x3b2   : > { %v1880_v28 = vadd.f32 %v3572_v1, %v1879_v51 }
 0x3b3   : > { %2008 = vst.msk [vmem:[%s3579_s8 + $0x48] sm:$0xff] %vm1998_vm1, %v1885_v11 }
 0x3b4   : > { %2007 = vst.msk [vmem:[%s3579_s8 + $0x40] sm:$0xff] %vm1998_vm1, %v1880_v28 }
 0x3b5   : > { %v2216_v23 = vpop.f32.mrb[8].mxu1 }
 0x3b6   : > { %v1965_v30 = vadd.f32 %v2216_v23, %v3572_v1  ;;  %v1959_v33 = vpop.f32.mrb[9].mxu1 }
 0x3b7   : > { %v1960_v10 = vadd.f32 %v3572_v1, %v1959_v33 }
 0x3b8   : > { %2024 = vst.msk [vmem:[%s3579_s8 + $0xc8] sm:$0xff] %vm1998_vm1, %v1965_v30  ;;  %v2195_v18 = vpop.f32.mrb[10].mxu0 }
 0x3b9   : > { %2023 = vst.msk [vmem:[%s3579_s8 + $0xc0] sm:$0xff] %vm1998_vm1, %v1960_v10  ;;  %v1895_v16 = vadd.f32 %v2195_v18, %v3572_v1  ;;  %v1889_v31 = vpop.f32.mrb[11].mxu0 }
 0x3ba   : > { %v1890_v61 = vadd.f32 %v3572_v1, %v1889_v31 }
 0x3bb   : > { %2010 = vst.msk [vmem:[%s3579_s8 + $0x58] sm:$0xff] %vm1998_vm1, %v1895_v16 }
 0x3bc   : > { %2009 = vst.msk [vmem:[%s3579_s8 + $0x50] sm:$0xff] %vm1998_vm1, %v1890_v61 }
 0x3bd   : > { %v2219_v60 = vpop.f32.mrb[10].mxu1 }
 0x3be   : > { %v1975_v19 = vadd.f32 %v2219_v60, %v3572_v1  ;;  %v1969_v20 = vpop.f32.mrb[11].mxu1 }
 0x3bf   : > { %v1970_v17 = vadd.f32 %v3572_v1, %v1969_v20 }
 0x3c0   : > { %2026 = vst.msk [vmem:[%s3579_s8 + $0xd8] sm:$0xff] %vm1998_vm1, %v1975_v19 }
 0x3c1   : > { %2025 = vst.msk [vmem:[%s3579_s8 + $0xd0] sm:$0xff] %vm1998_vm1, %v1970_v17 }
 0x3d3   : > { %v2198_v56 = vpop.f32.mrb[12].mxu0 }
 0x3d4   : > { %v1905_v53 = vadd.f32 %v2198_v56, %v3572_v1  ;;  %v1899_v38 = vpop.f32.mrb[13].mxu0 }
 0x3d5   : > { %v1900_v63 = vadd.f32 %v3572_v1, %v1899_v38 }
 0x3d6   : > { %2012 = vst.msk [vmem:[%s3579_s8 + $0x68] sm:$0xff] %vm1998_vm1, %v1905_v53 }
 0x3d7   : > { %2011 = vst.msk [vmem:[%s3579_s8 + $0x60] sm:$0xff] %vm1998_vm1, %v1900_v63 }
 0x3dd   : > { %v2222_v62 = vpop.f32.mrb[12].mxu1 }
 0x3de   : > { %v1985_v32 = vadd.f32 %v2222_v62, %v3572_v1  ;;  %v1979_v36 = vpop.f32.mrb[13].mxu1 }
 0x3df   : > { %v1980_v21 = vadd.f32 %v3572_v1, %v1979_v36 }
 0x3e0   : > { %2028 = vst.msk [vmem:[%s3579_s8 + $0xe8] sm:$0xff] %vm1998_vm1, %v1985_v32 }
 0x3e1   : > { %2027 = vst.msk [vmem:[%s3579_s8 + $0xe0] sm:$0xff] %vm1998_vm1, %v1980_v21 }
 0x3ef   : > { %v2201_v44 = vpop.f32.mrb[14].mxu0 }
 0x3f0   : > { %v1915_v22 = vadd.f32 %v2201_v44, %v3572_v1  ;;  %v1909_v12 = vpop.f32.mrb[15].mxu0 }
 0x3f1   : > { %v1910_v6 = vadd.f32 %v3572_v1, %v1909_v12 }
 0x3f2   : > { %2014 = vst.msk [vmem:[%s3579_s8 + $0x78] sm:$0xff] %vm1998_vm1, %v1915_v22 }
 0x3f3   : > { %2013 = vst.msk [vmem:[%s3579_s8 + $0x70] sm:$0xff] %vm1998_vm1, %v1910_v6  ;;  %v2225_v58 = vpop.f32.mrb[14].mxu1 }
 0x3f4   : > { %v1995_v9 = vadd.f32 %v2225_v58, %v3572_v1  ;;  %v1989_v52 = vpop.f32.mrb[15].mxu1 }
 0x3f5   : > { %v1990_v49 = vadd.f32 %v3572_v1, %v1989_v52 }
 0x3f6   : > { %2030 = vst.msk [vmem:[%s3579_s8 + $0xf8] sm:$0xff] %vm1998_vm1, %v1995_v9 }
 0x3f7   : > { %2029 = vst.msk [vmem:[%s3579_s8 + $0xf0] sm:$0xff] %vm1998_vm1, %v1990_v49 }
 0x3f8 PF: > { %s17_s24 = sadd.s32 1, %s2360_s24  }
 0x3f9   : > { %p14_p4 = scmp.ge.s32.totalorder %s17_s24, 4  }
 0x3fb   :  { %16 = sbr.rel (!%p14_p4) target bundleno = 1 (0x1), region = 78 }

</bundles_post_ra>
